<compile_context>
chip_gen: v7x
topology: tpu7x:2x2x1
jax: 0.10.0
libtpu: 0.0.40
codegen_flags: <defaults>
</compile_context>

<pallas_src>
import numpy as np
import jax
import jax.numpy as jnp
from jax import lax
from jax.experimental import pallas as pl
from jax.experimental.pallas import tpu as pltpu

HIDDEN_SIZE = 2
INPUT_SIZE = 4
NUM_LAYERS = 2
FC1_DIM = 128
NSLOT = 4          # state slots: [h1_u0, h1_u1, h0_u0, h0_u1]
CLANES = 16        # 4 gates (i,f,g,o) x 4 slots


def row_layout(batch):
    """Row offsets inside the packed (rows, 128) parameter array."""
    wx = 0                              # (INPUT_SIZE, 16)  x -> layer-0 gate cols
    wc = wx + INPUT_SIZE                # (4*batch, 16)     recurrent rows, batch-replicated
    bc = wc + NSLOT * batch             # (batch, 16)       fused biases, batch-replicated
    fc1w = bc + batch                   # (H, 128)
    fc1b = fc1w + HIDDEN_SIZE           # (1, 128)
    fc2b = fc1b + 1                     # (1, 1)
    rows = ((fc2b + 1 + 7) // 8) * 8
    return dict(wx=wx, wc=wc, bc=bc, fc1w=fc1w, fc1b=fc1b, fc2b=fc2b, rows=rows)


def lstm2_kernel(x_ref, p_ref, fc2w_ref, out_ref, hacc_ref):
    """Whole forward pass in VMEM (shapes are tiny; everything is one block).

    x_ref:    (seq+1, batch, input)   last timestep is a zero pad (dead read)
    p_ref:    (rows, 128)             packed parameters (see row_layout)
    fc2w_ref: (128, 8)                fc2 weight in column 0
    out_ref:  (seq*batch, 8)          column 0 = fc2 output (bias included)
    hacc_ref: (seq*batch, H)          VMEM scratch: per-step h1 accumulator
    """
    seq_p1, batch, isz = x_ref.shape
    seq = seq_p1 - 1
    H = HIDDEN_SIZE
    C = CLANES
    L = row_layout(batch)

    P = p_ref[...]
    wx = P[L['wx']:L['wx'] + isz, 0:C]                                   # (in, 16)
    wc_rep = [P[L['wc'] + k * batch:L['wc'] + (k + 1) * batch, 0:C]
              for k in range(NSLOT)]                                     # 4 x (batch, 16)
    b_c = P[L['bc']:L['bc'] + batch, 0:C]                                # (batch, 16)
    fc1w = P[L['fc1w']:L['fc1w'] + H, :]                                 # (H, 128)
    fc1b = P[L['fc1b']:L['fc1b'] + 1, :]                                 # (1, 128)
    fc2b = P[L['fc2b']:L['fc2b'] + 1, 0:1]                               # (1, 1)

    # Layer-0 input contribution (+ both layers' fused biases) for all
    # timesteps: one matmul + one add, off the serial recurrence path.
    x = x_ref[...].astype(jnp.float32)
    x2d = x.reshape(seq_p1 * batch, isz)
    xg = jnp.dot(x2d, wx, preferred_element_type=jnp.float32)            # (seq+1*b, 16)
    xg3 = xg.reshape(seq_p1, batch, C) + b_c[None, :, :]

    lane4 = lax.broadcasted_iota(jnp.int32, (batch, NSLOT), 1)
    keep_l0 = lane4 >= 2                                                 # slots 2,3 = layer 0

    def cell_step(xg_t, h_all, c_all):
        # Recurrent contraction over the 4 state slots (VPU; 4 lane broadcasts).
        rec = (h_all[:, 0:1] * wc_rep[0] + h_all[:, 1:2] * wc_rep[1]
               + h_all[:, 2:3] * wc_rep[2] + h_all[:, 3:4] * wc_rep[3])
        pre = xg_t + rec                                                 # (batch, 16)
        sg = jax.nn.sigmoid(pre)                                         # 1 EUP op
        th = jnp.tanh(pre)                                               # 1 EUP op
        i_g = sg[:, 0:4]
        f_g = sg[:, 4:8]
        g_g = th[:, 8:12]
        o_g = sg[:, 12:16]
        c_new = f_g * c_all + i_g * g_g                                  # (batch, 4)
        h_new = o_g * jnp.tanh(c_new)
        return h_new, c_new

    # Prologue: layer-0 cell at t=0 (zero initial state); mask away the
    # (meaningless) layer-1 half so h1(-1)=c1(-1)=0 going into the loop.
    zeros4 = jnp.zeros((batch, NSLOT), jnp.float32)
    h_all, c_all = cell_step(xg3[0], zeros4, zeros4)
    h_all = jnp.where(keep_l0, h_all, 0.0)
    c_all = jnp.where(keep_l0, c_all, 0.0)

    # Pipelined fused steps: step t computes layer-1(t) and layer-0(t+1)
    # together (both only need h0(t)).  seq is small & static -> unrolled.
    # TODO(synk): for seq >~ 32-64 switch this to lax.fori_loop to bound
    # vreg live ranges (keep the accumulator in hacc_ref as done here).
    for t in range(seq):
        h_all, c_all = cell_step(xg3[t + 1], h_all, c_all)
        hacc_ref[pl.ds(t * batch, batch), :] = h_all[:, 0:H]             # h1(t)

    # FC head (hoisted out of the loop): ReLU -> fc1 -> ReLU -> fc2 (MXU).
    hseq = hacc_ref[...]                                                 # (seq*b, H)
    z = jnp.maximum(hseq, 0.0)
    z = jnp.dot(z, fc1w, preferred_element_type=jnp.float32) + fc1b
    z = jnp.maximum(z, 0.0)                                              # (seq*b, 128)
    y = jnp.dot(z, fc2w_ref[...], preferred_element_type=jnp.float32) + fc2b
    out_ref[...] = y                                                     # (seq*b, 8)


def init_params(key):
    """Deterministic PyTorch-style uniform(-1/sqrt(fan_in), 1/sqrt(fan_in)) init."""
    keys = jax.random.split(key, 12)
    kl = 1.0 / (HIDDEN_SIZE ** 0.5)

    def u(k_, shape, bound):
        return jax.random.uniform(k_, shape, jnp.float32, -bound, bound)

    p = {}
    p['w_ih_l0'] = u(keys[0], (4 * HIDDEN_SIZE, INPUT_SIZE), kl)
    p['w_hh_l0'] = u(keys[1], (4 * HIDDEN_SIZE, HIDDEN_SIZE), kl)
    p['b_ih_l0'] = u(keys[2], (4 * HIDDEN_SIZE,), kl)
    p['b_hh_l0'] = u(keys[3], (4 * HIDDEN_SIZE,), kl)
    p['w_ih_l1'] = u(keys[4], (4 * HIDDEN_SIZE, HIDDEN_SIZE), kl)
    p['w_hh_l1'] = u(keys[5], (4 * HIDDEN_SIZE, HIDDEN_SIZE), kl)
    p['b_ih_l1'] = u(keys[6], (4 * HIDDEN_SIZE,), kl)
    p['b_hh_l1'] = u(keys[7], (4 * HIDDEN_SIZE,), kl)
    k1 = 1.0 / (HIDDEN_SIZE ** 0.5)
    p['fc1_w'] = u(keys[8], (FC1_DIM, HIDDEN_SIZE), k1)
    p['fc1_b'] = u(keys[9], (FC1_DIM,), k1)
    k2 = 1.0 / (FC1_DIM ** 0.5)
    p['fc2_w'] = u(keys[10], (1, FC1_DIM), k2)
    p['fc2_b'] = u(keys[11], (1,), k2)
    return p


def pack_params(params, batch):
    """One-time host-side packing.

    Combined lane layout (16 lanes): column j = gate*4 + slot, gate order
    (i, f, g, o), slot 0,1 = layer-1 unit 0,1 and slot 2,3 = layer-0 unit 0,1.
    Recurrent input rows: k = 0,1 -> h1 units; k = 2,3 -> h0 units.
    """
    H = HIDDEN_SIZE
    p = {k: np.asarray(v, dtype=np.float32) for k, v in params.items()}
    L = row_layout(batch)

    def gm(w):
        # (4H, K) gate-major -> (K, gate, unit)
        return w.reshape(4, H, -1).transpose(2, 0, 1)

    wc4 = np.zeros((NSLOT, 4, 4), np.float32)          # (in_slot, gate, out_slot)
    wc4[0:2, :, 0:2] = gm(p['w_hh_l1'])                # h1 -> layer-1 gates
    wc4[2:4, :, 0:2] = gm(p['w_ih_l1'])                # h0 -> layer-1 gates
    wc4[2:4, :, 2:4] = gm(p['w_hh_l0'])                # h0 -> layer-0 gates (next step)
    wc = wc4.reshape(NSLOT, CLANES)

    wx4 = np.zeros((INPUT_SIZE, 4, 4), np.float32)
    wx4[:, :, 2:4] = gm(p['w_ih_l0'])                  # x -> layer-0 gates
    wx = wx4.reshape(INPUT_SIZE, CLANES)

    bc4 = np.zeros((4, 4), np.float32)
    bc4[:, 0:2] = (p['b_ih_l1'] + p['b_hh_l1']).reshape(4, H)
    bc4[:, 2:4] = (p['b_ih_l0'] + p['b_hh_l0']).reshape(4, H)
    bc = bc4.reshape(CLANES)

    P = np.zeros((L['rows'], FC1_DIM), np.float32)
    P[L['wx']:L['wx'] + INPUT_SIZE, 0:CLANES] = wx
    for k in range(NSLOT):                             # pre-replicate across batch sublanes
        P[L['wc'] + k * batch:L['wc'] + (k + 1) * batch, 0:CLANES] = wc[k]
    P[L['bc']:L['bc'] + batch, 0:CLANES] = bc
    P[L['fc1w']:L['fc1w'] + H, :] = p['fc1_w'].T
    P[L['fc1b'], :] = p['fc1_b']
    P[L['fc2b'], 0] = p['fc2_b'][0]

    fc2col = np.zeros((FC1_DIM, 8), np.float32)
    fc2col[:, 0] = p['fc2_w'][0]

    return jnp.asarray(P), jnp.asarray(fc2col)


def _lstm2_forward_impl(x, packed, fc2col):
    seq, batch, isz = x.shape
    x32 = x.astype(jnp.float32)
    # One zero lookahead timestep so the fused (layer-1(t), layer-0(t+1)) step
    # at t = seq-1 has a (dead) x term to read.
    x_pad = jnp.concatenate([x32, jnp.zeros((1, batch, isz), jnp.float32)], axis=0)

    vmem = pl.BlockSpec(memory_space=pltpu.MemorySpace.VMEM)
    y8 = pl.pallas_call(
        lstm2_kernel,
        out_shape=jax.ShapeDtypeStruct((seq * batch, 8), jnp.float32),
        in_specs=[vmem, vmem, vmem],
        out_specs=vmem,
        scratch_shapes=[pltpu.VMEM((seq * batch, HIDDEN_SIZE), jnp.float32)],
    )(x_pad, packed, fc2col)

    out = y8[:, 0].reshape(seq, batch, 1)
    # torch.squeeze(x, 1): only removes axis 1 if it has size 1.
    if batch == 1:
        out = jnp.squeeze(out, axis=1)
    return out


lstm2_forward = jax.jit(_lstm2_forward_impl)


def lstm2_reference(x, params):
    """Pure-JAX reference mirroring the PyTorch module."""
    H = HIDDEN_SIZE
    seq, batch, _ = x.shape

    def cell(x_t, h, c, wih, whh, bih, bhh):
        g = x_t @ wih.T + bih + h @ whh.T + bhh
        i = jax.nn.sigmoid(g[:, 0:H])
        f = jax.nn.sigmoid(g[:, H:2 * H])
        gg = jnp.tanh(g[:, 2 * H:3 * H])
        o = jax.nn.sigmoid(g[:, 3 * H:4 * H])
        c = f * c + i * gg
        h = o * jnp.tanh(c)
        return h, c

    h0 = c0 = h1 = c1 = jnp.zeros((batch, H), jnp.float32)
    outs = []
    for t in range(seq):
        h0, c0 = cell(x[t], h0, c0, params['w_ih_l0'], params['w_hh_l0'],
                      params['b_ih_l0'], params['b_hh_l0'])
        h1, c1 = cell(h0, h1, c1, params['w_ih_l1'], params['w_hh_l1'],
                      params['b_ih_l1'], params['b_hh_l1'])
        outs.append(h1)
    hseq = jnp.stack(outs)                                       # (seq, batch, H)
    z = jnp.maximum(hseq, 0.0)
    z = jnp.maximum(z @ params['fc1_w'].T + params['fc1_b'], 0.0)
    z = z @ params['fc2_w'].T + params['fc2_b']                  # (seq, batch, 1)
    if z.shape[1] == 1:
        z = jnp.squeeze(z, axis=1)
    return z


if __name__ == "__main__":
    key = jax.random.PRNGKey(0)
    kp, kx = jax.random.split(key)
    params = init_params(kp)

    SEQ, BATCH = 8, 2
    x = jax.random.normal(kx, (SEQ, BATCH, INPUT_SIZE), jnp.float32)

    # Packing runs ONCE, outside the per-call path (perf-review item 1).
    packed, fc2col = pack_params(params, batch=BATCH)

    out = lstm2_forward(x, packed, fc2col)
    out = jax.block_until_ready(out)

    ref = lstm2_reference(x, params)
    assert out.shape == ref.shape, (out.shape, ref.shape)
    assert jnp.allclose(out, ref, atol=1e-4, rtol=1e-4), "mismatch vs reference"

    print("KERNEL_OK")
</pallas_src>

<mosaic_0001>
module attributes {stable_mosaic.version = 11 : i64} {
  func.func @lstm2_kernel(%arg0: memref<9x2x4xf32, #tpu.memory_space<vmem>>, %arg1: memref<24x128xf32, #tpu.memory_space<vmem>>, %arg2: memref<128x8xf32, #tpu.memory_space<vmem>>, %arg3: memref<16x8xf32, #tpu.memory_space<vmem>>, %arg4: memref<16x2xf32, #tpu.memory_space<vmem>>) attributes {dimension_semantics = [], scalar_prefetch = 0 : i64, scratch_operands = 1 : i64, tpu.core_type = #tpu.core_type<tc>} {
    %c0 = arith.constant 0 : index
    %c0_0 = arith.constant 0 : index
    %0 = vector.load %arg1[%c0, %c0_0] : memref<24x128xf32, #tpu.memory_space<vmem>>, vector<24x128xf32>
    %1 = vector.extract_strided_slice %0 {offsets = [0, 0], sizes = [4, 16], strides = [1, 1]} : vector<24x128xf32> to vector<4x16xf32>
    %2 = vector.extract_strided_slice %0 {offsets = [4, 0], sizes = [2, 16], strides = [1, 1]} : vector<24x128xf32> to vector<2x16xf32>
    %3 = vector.extract_strided_slice %0 {offsets = [6, 0], sizes = [2, 16], strides = [1, 1]} : vector<24x128xf32> to vector<2x16xf32>
    %4 = vector.extract_strided_slice %0 {offsets = [8, 0], sizes = [2, 16], strides = [1, 1]} : vector<24x128xf32> to vector<2x16xf32>
    %5 = vector.extract_strided_slice %0 {offsets = [10, 0], sizes = [2, 16], strides = [1, 1]} : vector<24x128xf32> to vector<2x16xf32>
    %6 = vector.extract_strided_slice %0 {offsets = [12, 0], sizes = [2, 16], strides = [1, 1]} : vector<24x128xf32> to vector<2x16xf32>
    %7 = vector.extract_strided_slice %0 {offsets = [14, 0], sizes = [2, 128], strides = [1, 1]} : vector<24x128xf32> to vector<2x128xf32>
    %8 = vector.extract_strided_slice %0 {offsets = [16, 0], sizes = [1, 128], strides = [1, 1]} : vector<24x128xf32> to vector<1x128xf32>
    %9 = vector.extract_strided_slice %0 {offsets = [17, 0], sizes = [1, 1], strides = [1, 1]} : vector<24x128xf32> to vector<1x1xf32>
    %c0_1 = arith.constant 0 : index
    %c0_2 = arith.constant 0 : index
    %c0_3 = arith.constant 0 : index
    %10 = vector.load %arg0[%c0_1, %c0_2, %c0_3] : memref<9x2x4xf32, #tpu.memory_space<vmem>>, vector<9x2x4xf32>
    %11 = vector.shape_cast %10 : vector<9x2x4xf32> to vector<18x4xf32>
    %cst = arith.constant dense<0.000000e+00> : vector<18x16xf32>
    %12 = tpu.matmul %11, %1, %cst {dimension_numbers = #tpu.dot_dimension_numbers<[1], [0], [0], [1], [0, 0, 1, 1], [], []>} : vector<18x4xf32>, vector<4x16xf32>, vector<18x16xf32> -> vector<18x16xf32>
    %13 = vector.shape_cast %12 : vector<18x16xf32> to vector<9x2x16xf32>
    %14 = vector.shape_cast %6 : vector<2x16xf32> to vector<1x2x16xf32>
    %15 = vector.broadcast %14 : vector<1x2x16xf32> to vector<9x2x16xf32>
    %16 = arith.addf %13, %15 : vector<9x2x16xf32>
    %17 = tpu.iota {dimensions = array<i32: 1>} : vector<2x4xi32>
    %c2_i32 = arith.constant 2 : i32
    %18 = vector.broadcast %c2_i32 : i32 to vector<2x4xi32>
    %19 = arith.cmpi sge, %17, %18 : vector<2x4xi32>
    %cst_4 = arith.constant 0.000000e+00 : f32
    %20 = vector.broadcast %cst_4 : f32 to vector<2x4xf32>
    %21 = vector.extract_strided_slice %16 {offsets = [0, 0, 0], sizes = [1, 2, 16], strides = [1, 1, 1]} : vector<9x2x16xf32> to vector<1x2x16xf32>
    %22 = vector.shape_cast %21 : vector<1x2x16xf32> to vector<2x16xf32>
    %23 = vector.extract_strided_slice %20 {offsets = [0, 0], sizes = [2, 1], strides = [1, 1]} : vector<2x4xf32> to vector<2x1xf32>
    %24 = vector.broadcast %23 : vector<2x1xf32> to vector<2x16xf32>
    %25 = arith.mulf %24, %2 : vector<2x16xf32>
    %26 = vector.extract_strided_slice %20 {offsets = [0, 1], sizes = [2, 1], strides = [1, 1]} : vector<2x4xf32> to vector<2x1xf32>
    %27 = vector.broadcast %26 : vector<2x1xf32> to vector<2x16xf32>
    %28 = arith.mulf %27, %3 : vector<2x16xf32>
    %29 = arith.addf %25, %28 : vector<2x16xf32>
    %30 = vector.extract_strided_slice %20 {offsets = [0, 2], sizes = [2, 1], strides = [1, 1]} : vector<2x4xf32> to vector<2x1xf32>
    %31 = vector.broadcast %30 : vector<2x1xf32> to vector<2x16xf32>
    %32 = arith.mulf %31, %4 : vector<2x16xf32>
    %33 = arith.addf %29, %32 : vector<2x16xf32>
    %34 = vector.extract_strided_slice %20 {offsets = [0, 3], sizes = [2, 1], strides = [1, 1]} : vector<2x4xf32> to vector<2x1xf32>
    %35 = vector.broadcast %34 : vector<2x1xf32> to vector<2x16xf32>
    %36 = arith.mulf %35, %5 : vector<2x16xf32>
    %37 = arith.addf %33, %36 : vector<2x16xf32>
    %38 = arith.addf %22, %37 : vector<2x16xf32>
    %39 = arith.negf %38 : vector<2x16xf32>
    %40 = math.exp %39 : vector<2x16xf32>
    %cst_5 = arith.constant 1.000000e+00 : f32
    %41 = vector.broadcast %cst_5 : f32 to vector<2x16xf32>
    %42 = arith.addf %41, %40 : vector<2x16xf32>
    %43 = arith.divf %41, %42 : vector<2x16xf32>
    %44 = math.tanh %38 : vector<2x16xf32>
    %45 = vector.extract_strided_slice %43 {offsets = [0, 0], sizes = [2, 4], strides = [1, 1]} : vector<2x16xf32> to vector<2x4xf32>
    %46 = vector.extract_strided_slice %43 {offsets = [0, 4], sizes = [2, 4], strides = [1, 1]} : vector<2x16xf32> to vector<2x4xf32>
    %47 = vector.extract_strided_slice %44 {offsets = [0, 8], sizes = [2, 4], strides = [1, 1]} : vector<2x16xf32> to vector<2x4xf32>
    %48 = vector.extract_strided_slice %43 {offsets = [0, 12], sizes = [2, 4], strides = [1, 1]} : vector<2x16xf32> to vector<2x4xf32>
    %49 = arith.mulf %46, %20 : vector<2x4xf32>
    %50 = arith.mulf %45, %47 : vector<2x4xf32>
    %51 = arith.addf %49, %50 : vector<2x4xf32>
    %52 = math.tanh %51 : vector<2x4xf32>
    %53 = arith.mulf %48, %52 : vector<2x4xf32>
    %cst_6 = arith.constant 0.000000e+00 : f32
    %54 = vector.broadcast %cst_6 : f32 to vector<2x4xf32>
    %55 = arith.select %19, %53, %54 : vector<2x4xi1>, vector<2x4xf32>
    %cst_7 = arith.constant 0.000000e+00 : f32
    %56 = vector.broadcast %cst_7 : f32 to vector<2x4xf32>
    %57 = arith.select %19, %51, %56 : vector<2x4xi1>, vector<2x4xf32>
    %58 = vector.extract_strided_slice %16 {offsets = [1, 0, 0], sizes = [1, 2, 16], strides = [1, 1, 1]} : vector<9x2x16xf32> to vector<1x2x16xf32>
    %59 = vector.shape_cast %58 : vector<1x2x16xf32> to vector<2x16xf32>
    %60 = vector.extract_strided_slice %55 {offsets = [0, 0], sizes = [2, 1], strides = [1, 1]} : vector<2x4xf32> to vector<2x1xf32>
    %61 = vector.broadcast %60 : vector<2x1xf32> to vector<2x16xf32>
    %62 = arith.mulf %61, %2 : vector<2x16xf32>
    %63 = vector.extract_strided_slice %55 {offsets = [0, 1], sizes = [2, 1], strides = [1, 1]} : vector<2x4xf32> to vector<2x1xf32>
    %64 = vector.broadcast %63 : vector<2x1xf32> to vector<2x16xf32>
    %65 = arith.mulf %64, %3 : vector<2x16xf32>
    %66 = arith.addf %62, %65 : vector<2x16xf32>
    %67 = vector.extract_strided_slice %55 {offsets = [0, 2], sizes = [2, 1], strides = [1, 1]} : vector<2x4xf32> to vector<2x1xf32>
    %68 = vector.broadcast %67 : vector<2x1xf32> to vector<2x16xf32>
    %69 = arith.mulf %68, %4 : vector<2x16xf32>
    %70 = arith.addf %66, %69 : vector<2x16xf32>
    %71 = vector.extract_strided_slice %55 {offsets = [0, 3], sizes = [2, 1], strides = [1, 1]} : vector<2x4xf32> to vector<2x1xf32>
    %72 = vector.broadcast %71 : vector<2x1xf32> to vector<2x16xf32>
    %73 = arith.mulf %72, %5 : vector<2x16xf32>
    %74 = arith.addf %70, %73 : vector<2x16xf32>
    %75 = arith.addf %59, %74 : vector<2x16xf32>
    %76 = arith.negf %75 : vector<2x16xf32>
    %77 = math.exp %76 : vector<2x16xf32>
    %cst_8 = arith.constant 1.000000e+00 : f32
    %78 = vector.broadcast %cst_8 : f32 to vector<2x16xf32>
    %79 = arith.addf %78, %77 : vector<2x16xf32>
    %80 = arith.divf %78, %79 : vector<2x16xf32>
    %81 = math.tanh %75 : vector<2x16xf32>
    %82 = vector.extract_strided_slice %80 {offsets = [0, 0], sizes = [2, 4], strides = [1, 1]} : vector<2x16xf32> to vector<2x4xf32>
    %83 = vector.extract_strided_slice %80 {offsets = [0, 4], sizes = [2, 4], strides = [1, 1]} : vector<2x16xf32> to vector<2x4xf32>
    %84 = vector.extract_strided_slice %81 {offsets = [0, 8], sizes = [2, 4], strides = [1, 1]} : vector<2x16xf32> to vector<2x4xf32>
    %85 = vector.extract_strided_slice %80 {offsets = [0, 12], sizes = [2, 4], strides = [1, 1]} : vector<2x16xf32> to vector<2x4xf32>
    %86 = arith.mulf %83, %57 : vector<2x4xf32>
    %87 = arith.mulf %82, %84 : vector<2x4xf32>
    %88 = arith.addf %86, %87 : vector<2x4xf32>
    %89 = math.tanh %88 : vector<2x4xf32>
    %90 = arith.mulf %85, %89 : vector<2x4xf32>
    %91 = vector.extract_strided_slice %90 {offsets = [0, 0], sizes = [2, 2], strides = [1, 1]} : vector<2x4xf32> to vector<2x2xf32>
    %c0_9 = arith.constant 0 : index
    %c0_10 = arith.constant 0 : index
    %92 = vector.load %arg4[%c0_9, %c0_10] : memref<16x2xf32, #tpu.memory_space<vmem>>, vector<2x2xf32>
    tpu.vector_store %arg4[%c0_9, %c0_10], %91 {strides = array<i32>} : memref<16x2xf32, #tpu.memory_space<vmem>>, vector<2x2xf32>,
    %93 = vector.extract_strided_slice %16 {offsets = [2, 0, 0], sizes = [1, 2, 16], strides = [1, 1, 1]} : vector<9x2x16xf32> to vector<1x2x16xf32>
    %94 = vector.shape_cast %93 : vector<1x2x16xf32> to vector<2x16xf32>
    %95 = vector.extract_strided_slice %90 {offsets = [0, 0], sizes = [2, 1], strides = [1, 1]} : vector<2x4xf32> to vector<2x1xf32>
    %96 = vector.broadcast %95 : vector<2x1xf32> to vector<2x16xf32>
    %97 = arith.mulf %96, %2 : vector<2x16xf32>
    %98 = vector.extract_strided_slice %90 {offsets = [0, 1], sizes = [2, 1], strides = [1, 1]} : vector<2x4xf32> to vector<2x1xf32>
    %99 = vector.broadcast %98 : vector<2x1xf32> to vector<2x16xf32>
    %100 = arith.mulf %99, %3 : vector<2x16xf32>
    %101 = arith.addf %97, %100 : vector<2x16xf32>
    %102 = vector.extract_strided_slice %90 {offsets = [0, 2], sizes = [2, 1], strides = [1, 1]} : vector<2x4xf32> to vector<2x1xf32>
    %103 = vector.broadcast %102 : vector<2x1xf32> to vector<2x16xf32>
    %104 = arith.mulf %103, %4 : vector<2x16xf32>
    %105 = arith.addf %101, %104 : vector<2x16xf32>
    %106 = vector.extract_strided_slice %90 {offsets = [0, 3], sizes = [2, 1], strides = [1, 1]} : vector<2x4xf32> to vector<2x1xf32>
    %107 = vector.broadcast %106 : vector<2x1xf32> to vector<2x16xf32>
    %108 = arith.mulf %107, %5 : vector<2x16xf32>
    %109 = arith.addf %105, %108 : vector<2x16xf32>
    %110 = arith.addf %94, %109 : vector<2x16xf32>
    %111 = arith.negf %110 : vector<2x16xf32>
    %112 = math.exp %111 : vector<2x16xf32>
    %cst_11 = arith.constant 1.000000e+00 : f32
    %113 = vector.broadcast %cst_11 : f32 to vector<2x16xf32>
    %114 = arith.addf %113, %112 : vector<2x16xf32>
    %115 = arith.divf %113, %114 : vector<2x16xf32>
    %116 = math.tanh %110 : vector<2x16xf32>
    %117 = vector.extract_strided_slice %115 {offsets = [0, 0], sizes = [2, 4], strides = [1, 1]} : vector<2x16xf32> to vector<2x4xf32>
    %118 = vector.extract_strided_slice %115 {offsets = [0, 4], sizes = [2, 4], strides = [1, 1]} : vector<2x16xf32> to vector<2x4xf32>
    %119 = vector.extract_strided_slice %116 {offsets = [0, 8], sizes = [2, 4], strides = [1, 1]} : vector<2x16xf32> to vector<2x4xf32>
    %120 = vector.extract_strided_slice %115 {offsets = [0, 12], sizes = [2, 4], strides = [1, 1]} : vector<2x16xf32> to vector<2x4xf32>
    %121 = arith.mulf %118, %88 : vector<2x4xf32>
    %122 = arith.mulf %117, %119 : vector<2x4xf32>
    %123 = arith.addf %121, %122 : vector<2x4xf32>
    %124 = math.tanh %123 : vector<2x4xf32>
    %125 = arith.mulf %120, %124 : vector<2x4xf32>
    %126 = vector.extract_strided_slice %125 {offsets = [0, 0], sizes = [2, 2], strides = [1, 1]} : vector<2x4xf32> to vector<2x2xf32>
    %c2 = arith.constant 2 : index
    %c0_12 = arith.constant 0 : index
    %127 = vector.load %arg4[%c2, %c0_12] : memref<16x2xf32, #tpu.memory_space<vmem>>, vector<2x2xf32>
    tpu.vector_store %arg4[%c2, %c0_12], %126 {strides = array<i32>} : memref<16x2xf32, #tpu.memory_space<vmem>>, vector<2x2xf32>,
    %128 = vector.extract_strided_slice %16 {offsets = [3, 0, 0], sizes = [1, 2, 16], strides = [1, 1, 1]} : vector<9x2x16xf32> to vector<1x2x16xf32>
    %129 = vector.shape_cast %128 : vector<1x2x16xf32> to vector<2x16xf32>
    %130 = vector.extract_strided_slice %125 {offsets = [0, 0], sizes = [2, 1], strides = [1, 1]} : vector<2x4xf32> to vector<2x1xf32>
    %131 = vector.broadcast %130 : vector<2x1xf32> to vector<2x16xf32>
    %132 = arith.mulf %131, %2 : vector<2x16xf32>
    %133 = vector.extract_strided_slice %125 {offsets = [0, 1], sizes = [2, 1], strides = [1, 1]} : vector<2x4xf32> to vector<2x1xf32>
    %134 = vector.broadcast %133 : vector<2x1xf32> to vector<2x16xf32>
    %135 = arith.mulf %134, %3 : vector<2x16xf32>
    %136 = arith.addf %132, %135 : vector<2x16xf32>
    %137 = vector.extract_strided_slice %125 {offsets = [0, 2], sizes = [2, 1], strides = [1, 1]} : vector<2x4xf32> to vector<2x1xf32>
    %138 = vector.broadcast %137 : vector<2x1xf32> to vector<2x16xf32>
    %139 = arith.mulf %138, %4 : vector<2x16xf32>
    %140 = arith.addf %136, %139 : vector<2x16xf32>
    %141 = vector.extract_strided_slice %125 {offsets = [0, 3], sizes = [2, 1], strides = [1, 1]} : vector<2x4xf32> to vector<2x1xf32>
    %142 = vector.broadcast %141 : vector<2x1xf32> to vector<2x16xf32>
    %143 = arith.mulf %142, %5 : vector<2x16xf32>
    %144 = arith.addf %140, %143 : vector<2x16xf32>
    %145 = arith.addf %129, %144 : vector<2x16xf32>
    %146 = arith.negf %145 : vector<2x16xf32>
    %147 = math.exp %146 : vector<2x16xf32>
    %cst_13 = arith.constant 1.000000e+00 : f32
    %148 = vector.broadcast %cst_13 : f32 to vector<2x16xf32>
    %149 = arith.addf %148, %147 : vector<2x16xf32>
    %150 = arith.divf %148, %149 : vector<2x16xf32>
    %151 = math.tanh %145 : vector<2x16xf32>
    %152 = vector.extract_strided_slice %150 {offsets = [0, 0], sizes = [2, 4], strides = [1, 1]} : vector<2x16xf32> to vector<2x4xf32>
    %153 = vector.extract_strided_slice %150 {offsets = [0, 4], sizes = [2, 4], strides = [1, 1]} : vector<2x16xf32> to vector<2x4xf32>
    %154 = vector.extract_strided_slice %151 {offsets = [0, 8], sizes = [2, 4], strides = [1, 1]} : vector<2x16xf32> to vector<2x4xf32>
    %155 = vector.extract_strided_slice %150 {offsets = [0, 12], sizes = [2, 4], strides = [1, 1]} : vector<2x16xf32> to vector<2x4xf32>
    %156 = arith.mulf %153, %123 : vector<2x4xf32>
    %157 = arith.mulf %152, %154 : vector<2x4xf32>
    %158 = arith.addf %156, %157 : vector<2x4xf32>
    %159 = math.tanh %158 : vector<2x4xf32>
    %160 = arith.mulf %155, %159 : vector<2x4xf32>
    %161 = vector.extract_strided_slice %160 {offsets = [0, 0], sizes = [2, 2], strides = [1, 1]} : vector<2x4xf32> to vector<2x2xf32>
    %c4 = arith.constant 4 : index
    %c0_14 = arith.constant 0 : index
    %162 = vector.load %arg4[%c4, %c0_14] : memref<16x2xf32, #tpu.memory_space<vmem>>, vector<2x2xf32>
    tpu.vector_store %arg4[%c4, %c0_14], %161 {strides = array<i32>} : memref<16x2xf32, #tpu.memory_space<vmem>>, vector<2x2xf32>,
    %163 = vector.extract_strided_slice %16 {offsets = [4, 0, 0], sizes = [1, 2, 16], strides = [1, 1, 1]} : vector<9x2x16xf32> to vector<1x2x16xf32>
    %164 = vector.shape_cast %163 : vector<1x2x16xf32> to vector<2x16xf32>
    %165 = vector.extract_strided_slice %160 {offsets = [0, 0], sizes = [2, 1], strides = [1, 1]} : vector<2x4xf32> to vector<2x1xf32>
    %166 = vector.broadcast %165 : vector<2x1xf32> to vector<2x16xf32>
    %167 = arith.mulf %166, %2 : vector<2x16xf32>
    %168 = vector.extract_strided_slice %160 {offsets = [0, 1], sizes = [2, 1], strides = [1, 1]} : vector<2x4xf32> to vector<2x1xf32>
    %169 = vector.broadcast %168 : vector<2x1xf32> to vector<2x16xf32>
    %170 = arith.mulf %169, %3 : vector<2x16xf32>
    %171 = arith.addf %167, %170 : vector<2x16xf32>
    %172 = vector.extract_strided_slice %160 {offsets = [0, 2], sizes = [2, 1], strides = [1, 1]} : vector<2x4xf32> to vector<2x1xf32>
    %173 = vector.broadcast %172 : vector<2x1xf32> to vector<2x16xf32>
    %174 = arith.mulf %173, %4 : vector<2x16xf32>
    %175 = arith.addf %171, %174 : vector<2x16xf32>
    %176 = vector.extract_strided_slice %160 {offsets = [0, 3], sizes = [2, 1], strides = [1, 1]} : vector<2x4xf32> to vector<2x1xf32>
    %177 = vector.broadcast %176 : vector<2x1xf32> to vector<2x16xf32>
    %178 = arith.mulf %177, %5 : vector<2x16xf32>
    %179 = arith.addf %175, %178 : vector<2x16xf32>
    %180 = arith.addf %164, %179 : vector<2x16xf32>
    %181 = arith.negf %180 : vector<2x16xf32>
    %182 = math.exp %181 : vector<2x16xf32>
    %cst_15 = arith.constant 1.000000e+00 : f32
    %183 = vector.broadcast %cst_15 : f32 to vector<2x16xf32>
    %184 = arith.addf %183, %182 : vector<2x16xf32>
    %185 = arith.divf %183, %184 : vector<2x16xf32>
    %186 = math.tanh %180 : vector<2x16xf32>
    %187 = vector.extract_strided_slice %185 {offsets = [0, 0], sizes = [2, 4], strides = [1, 1]} : vector<2x16xf32> to vector<2x4xf32>
    %188 = vector.extract_strided_slice %185 {offsets = [0, 4], sizes = [2, 4], strides = [1, 1]} : vector<2x16xf32> to vector<2x4xf32>
    %189 = vector.extract_strided_slice %186 {offsets = [0, 8], sizes = [2, 4], strides = [1, 1]} : vector<2x16xf32> to vector<2x4xf32>
    %190 = vector.extract_strided_slice %185 {offsets = [0, 12], sizes = [2, 4], strides = [1, 1]} : vector<2x16xf32> to vector<2x4xf32>
    %191 = arith.mulf %188, %158 : vector<2x4xf32>
    %192 = arith.mulf %187, %189 : vector<2x4xf32>
    %193 = arith.addf %191, %192 : vector<2x4xf32>
    %194 = math.tanh %193 : vector<2x4xf32>
    %195 = arith.mulf %190, %194 : vector<2x4xf32>
    %196 = vector.extract_strided_slice %195 {offsets = [0, 0], sizes = [2, 2], strides = [1, 1]} : vector<2x4xf32> to vector<2x2xf32>
    %c6 = arith.constant 6 : index
    %c0_16 = arith.constant 0 : index
    %197 = vector.load %arg4[%c6, %c0_16] : memref<16x2xf32, #tpu.memory_space<vmem>>, vector<2x2xf32>
    tpu.vector_store %arg4[%c6, %c0_16], %196 {strides = array<i32>} : memref<16x2xf32, #tpu.memory_space<vmem>>, vector<2x2xf32>,
    %198 = vector.extract_strided_slice %16 {offsets = [5, 0, 0], sizes = [1, 2, 16], strides = [1, 1, 1]} : vector<9x2x16xf32> to vector<1x2x16xf32>
    %199 = vector.shape_cast %198 : vector<1x2x16xf32> to vector<2x16xf32>
    %200 = vector.extract_strided_slice %195 {offsets = [0, 0], sizes = [2, 1], strides = [1, 1]} : vector<2x4xf32> to vector<2x1xf32>
    %201 = vector.broadcast %200 : vector<2x1xf32> to vector<2x16xf32>
    %202 = arith.mulf %201, %2 : vector<2x16xf32>
    %203 = vector.extract_strided_slice %195 {offsets = [0, 1], sizes = [2, 1], strides = [1, 1]} : vector<2x4xf32> to vector<2x1xf32>
    %204 = vector.broadcast %203 : vector<2x1xf32> to vector<2x16xf32>
    %205 = arith.mulf %204, %3 : vector<2x16xf32>
    %206 = arith.addf %202, %205 : vector<2x16xf32>
    %207 = vector.extract_strided_slice %195 {offsets = [0, 2], sizes = [2, 1], strides = [1, 1]} : vector<2x4xf32> to vector<2x1xf32>
    %208 = vector.broadcast %207 : vector<2x1xf32> to vector<2x16xf32>
    %209 = arith.mulf %208, %4 : vector<2x16xf32>
    %210 = arith.addf %206, %209 : vector<2x16xf32>
    %211 = vector.extract_strided_slice %195 {offsets = [0, 3], sizes = [2, 1], strides = [1, 1]} : vector<2x4xf32> to vector<2x1xf32>
    %212 = vector.broadcast %211 : vector<2x1xf32> to vector<2x16xf32>
    %213 = arith.mulf %212, %5 : vector<2x16xf32>
    %214 = arith.addf %210, %213 : vector<2x16xf32>
    %215 = arith.addf %199, %214 : vector<2x16xf32>
    %216 = arith.negf %215 : vector<2x16xf32>
    %217 = math.exp %216 : vector<2x16xf32>
    %cst_17 = arith.constant 1.000000e+00 : f32
    %218 = vector.broadcast %cst_17 : f32 to vector<2x16xf32>
    %219 = arith.addf %218, %217 : vector<2x16xf32>
    %220 = arith.divf %218, %219 : vector<2x16xf32>
    %221 = math.tanh %215 : vector<2x16xf32>
    %222 = vector.extract_strided_slice %220 {offsets = [0, 0], sizes = [2, 4], strides = [1, 1]} : vector<2x16xf32> to vector<2x4xf32>
    %223 = vector.extract_strided_slice %220 {offsets = [0, 4], sizes = [2, 4], strides = [1, 1]} : vector<2x16xf32> to vector<2x4xf32>
    %224 = vector.extract_strided_slice %221 {offsets = [0, 8], sizes = [2, 4], strides = [1, 1]} : vector<2x16xf32> to vector<2x4xf32>
    %225 = vector.extract_strided_slice %220 {offsets = [0, 12], sizes = [2, 4], strides = [1, 1]} : vector<2x16xf32> to vector<2x4xf32>
    %226 = arith.mulf %223, %193 : vector<2x4xf32>
    %227 = arith.mulf %222, %224 : vector<2x4xf32>
    %228 = arith.addf %226, %227 : vector<2x4xf32>
    %229 = math.tanh %228 : vector<2x4xf32>
    %230 = arith.mulf %225, %229 : vector<2x4xf32>
    %231 = vector.extract_strided_slice %230 {offsets = [0, 0], sizes = [2, 2], strides = [1, 1]} : vector<2x4xf32> to vector<2x2xf32>
    %c8 = arith.constant 8 : index
    %c0_18 = arith.constant 0 : index
    %232 = vector.load %arg4[%c8, %c0_18] : memref<16x2xf32, #tpu.memory_space<vmem>>, vector<2x2xf32>
    tpu.vector_store %arg4[%c8, %c0_18], %231 {strides = array<i32>} : memref<16x2xf32, #tpu.memory_space<vmem>>, vector<2x2xf32>,
    %233 = vector.extract_strided_slice %16 {offsets = [6, 0, 0], sizes = [1, 2, 16], strides = [1, 1, 1]} : vector<9x2x16xf32> to vector<1x2x16xf32>
    %234 = vector.shape_cast %233 : vector<1x2x16xf32> to vector<2x16xf32>
    %235 = vector.extract_strided_slice %230 {offsets = [0, 0], sizes = [2, 1], strides = [1, 1]} : vector<2x4xf32> to vector<2x1xf32>
    %236 = vector.broadcast %235 : vector<2x1xf32> to vector<2x16xf32>
    %237 = arith.mulf %236, %2 : vector<2x16xf32>
    %238 = vector.extract_strided_slice %230 {offsets = [0, 1], sizes = [2, 1], strides = [1, 1]} : vector<2x4xf32> to vector<2x1xf32>
    %239 = vector.broadcast %238 : vector<2x1xf32> to vector<2x16xf32>
    %240 = arith.mulf %239, %3 : vector<2x16xf32>
    %241 = arith.addf %237, %240 : vector<2x16xf32>
    %242 = vector.extract_strided_slice %230 {offsets = [0, 2], sizes = [2, 1], strides = [1, 1]} : vector<2x4xf32> to vector<2x1xf32>
    %243 = vector.broadcast %242 : vector<2x1xf32> to vector<2x16xf32>
    %244 = arith.mulf %243, %4 : vector<2x16xf32>
    %245 = arith.addf %241, %244 : vector<2x16xf32>
    %246 = vector.extract_strided_slice %230 {offsets = [0, 3], sizes = [2, 1], strides = [1, 1]} : vector<2x4xf32> to vector<2x1xf32>
    %247 = vector.broadcast %246 : vector<2x1xf32> to vector<2x16xf32>
    %248 = arith.mulf %247, %5 : vector<2x16xf32>
    %249 = arith.addf %245, %248 : vector<2x16xf32>
    %250 = arith.addf %234, %249 : vector<2x16xf32>
    %251 = arith.negf %250 : vector<2x16xf32>
    %252 = math.exp %251 : vector<2x16xf32>
    %cst_19 = arith.constant 1.000000e+00 : f32
    %253 = vector.broadcast %cst_19 : f32 to vector<2x16xf32>
    %254 = arith.addf %253, %252 : vector<2x16xf32>
    %255 = arith.divf %253, %254 : vector<2x16xf32>
    %256 = math.tanh %250 : vector<2x16xf32>
    %257 = vector.extract_strided_slice %255 {offsets = [0, 0], sizes = [2, 4], strides = [1, 1]} : vector<2x16xf32> to vector<2x4xf32>
    %258 = vector.extract_strided_slice %255 {offsets = [0, 4], sizes = [2, 4], strides = [1, 1]} : vector<2x16xf32> to vector<2x4xf32>
    %259 = vector.extract_strided_slice %256 {offsets = [0, 8], sizes = [2, 4], strides = [1, 1]} : vector<2x16xf32> to vector<2x4xf32>
    %260 = vector.extract_strided_slice %255 {offsets = [0, 12], sizes = [2, 4], strides = [1, 1]} : vector<2x16xf32> to vector<2x4xf32>
    %261 = arith.mulf %258, %228 : vector<2x4xf32>
    %262 = arith.mulf %257, %259 : vector<2x4xf32>
    %263 = arith.addf %261, %262 : vector<2x4xf32>
    %264 = math.tanh %263 : vector<2x4xf32>
    %265 = arith.mulf %260, %264 : vector<2x4xf32>
    %266 = vector.extract_strided_slice %265 {offsets = [0, 0], sizes = [2, 2], strides = [1, 1]} : vector<2x4xf32> to vector<2x2xf32>
    %c10 = arith.constant 10 : index
    %c0_20 = arith.constant 0 : index
    %267 = vector.load %arg4[%c10, %c0_20] : memref<16x2xf32, #tpu.memory_space<vmem>>, vector<2x2xf32>
    tpu.vector_store %arg4[%c10, %c0_20], %266 {strides = array<i32>} : memref<16x2xf32, #tpu.memory_space<vmem>>, vector<2x2xf32>,
    %268 = vector.extract_strided_slice %16 {offsets = [7, 0, 0], sizes = [1, 2, 16], strides = [1, 1, 1]} : vector<9x2x16xf32> to vector<1x2x16xf32>
    %269 = vector.shape_cast %268 : vector<1x2x16xf32> to vector<2x16xf32>
    %270 = vector.extract_strided_slice %265 {offsets = [0, 0], sizes = [2, 1], strides = [1, 1]} : vector<2x4xf32> to vector<2x1xf32>
    %271 = vector.broadcast %270 : vector<2x1xf32> to vector<2x16xf32>
    %272 = arith.mulf %271, %2 : vector<2x16xf32>
    %273 = vector.extract_strided_slice %265 {offsets = [0, 1], sizes = [2, 1], strides = [1, 1]} : vector<2x4xf32> to vector<2x1xf32>
    %274 = vector.broadcast %273 : vector<2x1xf32> to vector<2x16xf32>
    %275 = arith.mulf %274, %3 : vector<2x16xf32>
    %276 = arith.addf %272, %275 : vector<2x16xf32>
    %277 = vector.extract_strided_slice %265 {offsets = [0, 2], sizes = [2, 1], strides = [1, 1]} : vector<2x4xf32> to vector<2x1xf32>
    %278 = vector.broadcast %277 : vector<2x1xf32> to vector<2x16xf32>
    %279 = arith.mulf %278, %4 : vector<2x16xf32>
    %280 = arith.addf %276, %279 : vector<2x16xf32>
    %281 = vector.extract_strided_slice %265 {offsets = [0, 3], sizes = [2, 1], strides = [1, 1]} : vector<2x4xf32> to vector<2x1xf32>
    %282 = vector.broadcast %281 : vector<2x1xf32> to vector<2x16xf32>
    %283 = arith.mulf %282, %5 : vector<2x16xf32>
    %284 = arith.addf %280, %283 : vector<2x16xf32>
    %285 = arith.addf %269, %284 : vector<2x16xf32>
    %286 = arith.negf %285 : vector<2x16xf32>
    %287 = math.exp %286 : vector<2x16xf32>
    %cst_21 = arith.constant 1.000000e+00 : f32
    %288 = vector.broadcast %cst_21 : f32 to vector<2x16xf32>
    %289 = arith.addf %288, %287 : vector<2x16xf32>
    %290 = arith.divf %288, %289 : vector<2x16xf32>
    %291 = math.tanh %285 : vector<2x16xf32>
    %292 = vector.extract_strided_slice %290 {offsets = [0, 0], sizes = [2, 4], strides = [1, 1]} : vector<2x16xf32> to vector<2x4xf32>
    %293 = vector.extract_strided_slice %290 {offsets = [0, 4], sizes = [2, 4], strides = [1, 1]} : vector<2x16xf32> to vector<2x4xf32>
    %294 = vector.extract_strided_slice %291 {offsets = [0, 8], sizes = [2, 4], strides = [1, 1]} : vector<2x16xf32> to vector<2x4xf32>
    %295 = vector.extract_strided_slice %290 {offsets = [0, 12], sizes = [2, 4], strides = [1, 1]} : vector<2x16xf32> to vector<2x4xf32>
    %296 = arith.mulf %293, %263 : vector<2x4xf32>
    %297 = arith.mulf %292, %294 : vector<2x4xf32>
    %298 = arith.addf %296, %297 : vector<2x4xf32>
    %299 = math.tanh %298 : vector<2x4xf32>
    %300 = arith.mulf %295, %299 : vector<2x4xf32>
    %301 = vector.extract_strided_slice %300 {offsets = [0, 0], sizes = [2, 2], strides = [1, 1]} : vector<2x4xf32> to vector<2x2xf32>
    %c12 = arith.constant 12 : index
    %c0_22 = arith.constant 0 : index
    %302 = vector.load %arg4[%c12, %c0_22] : memref<16x2xf32, #tpu.memory_space<vmem>>, vector<2x2xf32>
    tpu.vector_store %arg4[%c12, %c0_22], %301 {strides = array<i32>} : memref<16x2xf32, #tpu.memory_space<vmem>>, vector<2x2xf32>,
    %303 = vector.extract_strided_slice %16 {offsets = [8, 0, 0], sizes = [1, 2, 16], strides = [1, 1, 1]} : vector<9x2x16xf32> to vector<1x2x16xf32>
    %304 = vector.shape_cast %303 : vector<1x2x16xf32> to vector<2x16xf32>
    %305 = vector.extract_strided_slice %300 {offsets = [0, 0], sizes = [2, 1], strides = [1, 1]} : vector<2x4xf32> to vector<2x1xf32>
    %306 = vector.broadcast %305 : vector<2x1xf32> to vector<2x16xf32>
    %307 = arith.mulf %306, %2 : vector<2x16xf32>
    %308 = vector.extract_strided_slice %300 {offsets = [0, 1], sizes = [2, 1], strides = [1, 1]} : vector<2x4xf32> to vector<2x1xf32>
    %309 = vector.broadcast %308 : vector<2x1xf32> to vector<2x16xf32>
    %310 = arith.mulf %309, %3 : vector<2x16xf32>
    %311 = arith.addf %307, %310 : vector<2x16xf32>
    %312 = vector.extract_strided_slice %300 {offsets = [0, 2], sizes = [2, 1], strides = [1, 1]} : vector<2x4xf32> to vector<2x1xf32>
    %313 = vector.broadcast %312 : vector<2x1xf32> to vector<2x16xf32>
    %314 = arith.mulf %313, %4 : vector<2x16xf32>
    %315 = arith.addf %311, %314 : vector<2x16xf32>
    %316 = vector.extract_strided_slice %300 {offsets = [0, 3], sizes = [2, 1], strides = [1, 1]} : vector<2x4xf32> to vector<2x1xf32>
    %317 = vector.broadcast %316 : vector<2x1xf32> to vector<2x16xf32>
    %318 = arith.mulf %317, %5 : vector<2x16xf32>
    %319 = arith.addf %315, %318 : vector<2x16xf32>
    %320 = arith.addf %304, %319 : vector<2x16xf32>
    %321 = arith.negf %320 : vector<2x16xf32>
    %322 = math.exp %321 : vector<2x16xf32>
    %cst_23 = arith.constant 1.000000e+00 : f32
    %323 = vector.broadcast %cst_23 : f32 to vector<2x16xf32>
    %324 = arith.addf %323, %322 : vector<2x16xf32>
    %325 = arith.divf %323, %324 : vector<2x16xf32>
    %326 = math.tanh %320 : vector<2x16xf32>
    %327 = vector.extract_strided_slice %325 {offsets = [0, 0], sizes = [2, 4], strides = [1, 1]} : vector<2x16xf32> to vector<2x4xf32>
    %328 = vector.extract_strided_slice %325 {offsets = [0, 4], sizes = [2, 4], strides = [1, 1]} : vector<2x16xf32> to vector<2x4xf32>
    %329 = vector.extract_strided_slice %326 {offsets = [0, 8], sizes = [2, 4], strides = [1, 1]} : vector<2x16xf32> to vector<2x4xf32>
    %330 = vector.extract_strided_slice %325 {offsets = [0, 12], sizes = [2, 4], strides = [1, 1]} : vector<2x16xf32> to vector<2x4xf32>
    %331 = arith.mulf %328, %298 : vector<2x4xf32>
    %332 = arith.mulf %327, %329 : vector<2x4xf32>
    %333 = arith.addf %331, %332 : vector<2x4xf32>
    %334 = math.tanh %333 : vector<2x4xf32>
    %335 = arith.mulf %330, %334 : vector<2x4xf32>
    %336 = vector.extract_strided_slice %335 {offsets = [0, 0], sizes = [2, 2], strides = [1, 1]} : vector<2x4xf32> to vector<2x2xf32>
    %c14 = arith.constant 14 : index
    %c0_24 = arith.constant 0 : index
    %337 = vector.load %arg4[%c14, %c0_24] : memref<16x2xf32, #tpu.memory_space<vmem>>, vector<2x2xf32>
    tpu.vector_store %arg4[%c14, %c0_24], %336 {strides = array<i32>} : memref<16x2xf32, #tpu.memory_space<vmem>>, vector<2x2xf32>,
    %c0_25 = arith.constant 0 : index
    %c0_26 = arith.constant 0 : index
    %338 = vector.load %arg4[%c0_25, %c0_26] : memref<16x2xf32, #tpu.memory_space<vmem>>, vector<16x2xf32>
    %cst_27 = arith.constant 0.000000e+00 : f32
    %339 = vector.broadcast %cst_27 : f32 to vector<16x2xf32>
    %340 = arith.maximumf %338, %339 : vector<16x2xf32>
    %cst_28 = arith.constant dense<0.000000e+00> : vector<16x128xf32>
    %341 = tpu.matmul %340, %7, %cst_28 {dimension_numbers = #tpu.dot_dimension_numbers<[1], [0], [0], [1], [0, 0, 1, 1], [], []>} : vector<16x2xf32>, vector<2x128xf32>, vector<16x128xf32> -> vector<16x128xf32>
    %342 = vector.broadcast %8 : vector<1x128xf32> to vector<16x128xf32>
    %343 = arith.addf %341, %342 : vector<16x128xf32>
    %cst_29 = arith.constant 0.000000e+00 : f32
    %344 = vector.broadcast %cst_29 : f32 to vector<16x128xf32>
    %345 = arith.maximumf %343, %344 : vector<16x128xf32>
    %c0_30 = arith.constant 0 : index
    %c0_31 = arith.constant 0 : index
    %346 = vector.load %arg2[%c0_30, %c0_31] : memref<128x8xf32, #tpu.memory_space<vmem>>, vector<128x8xf32>
    %cst_32 = arith.constant dense<0.000000e+00> : vector<16x8xf32>
    %347 = tpu.matmul %345, %346, %cst_32 {dimension_numbers = #tpu.dot_dimension_numbers<[1], [0], [0], [1], [0, 0, 1, 1], [], []>} : vector<16x128xf32>, vector<128x8xf32>, vector<16x8xf32> -> vector<16x8xf32>
    %348 = vector.broadcast %9 : vector<1x1xf32> to vector<16x8xf32>
    %349 = arith.addf %347, %348 : vector<16x8xf32>
    %c0_33 = arith.constant 0 : index
    %c0_34 = arith.constant 0 : index
    %350 = vector.load %arg3[%c0_33, %c0_34] : memref<16x8xf32, #tpu.memory_space<vmem>>, vector<16x8xf32>
    tpu.vector_store %arg3[%c0_33, %c0_34], %349 {strides = array<i32>} : memref<16x8xf32, #tpu.memory_space<vmem>>, vector<16x8xf32>,
    return
  }
}

</mosaic_0001>

<bundles_post_ra>
// kernel: squeeze.1
= control target key start
LH: loop header
LB: loop body
LE: loop exit
PB: predicated region body
PF: predicated region fallthrough
CT: control target
= control target key end

     0   :  { %s66_s8 = smov 122   ;;  %vm7_vm0 = vcmask 15360   ;;  %s67_s11 = smov 124   ;;  %s117_s0 = inlined_call_operand.vmem [shape: f32[16], index: 0, kind: input, shape index: {}]   ;;  %s118_s1 = inlined_call_operand.vmem [shape: f32[8,2,1], index: 1, kind: output, shape index: {}]  }
   0x1   :  { %v4_v0 = vld [vmem:[%s117_s0] sm:$0x1]  ;;  %s65_s0 = smov 126   ;;  %s68_s12 = smov 120  }
   0x2   :  { %5 = vst [vmem:[#allocation0] sm:$0x1] %v4_v0  ;;  %s69_s13 = smov 118   ;;  %s70_s14 = smov 116  }
   0x3   :  { %s71_s15 = smov 114  }
   0x9   :  { %v9_v1 = vld [vmem:[#allocation0] sm:$0x1]  }
   0xa   :  { %v21_v2 = vld [vmem:[#allocation0] sm:$0x1]   ;;  %10 = vrot.lane.b32.xlu0 %v9_v1, %s65_s0 }
   0xb   :  { %22 = vrot.lane.b32.xlu1 %v21_v2, %s66_s8  ;;  %v15_v3 = vld [vmem:[#allocation0] sm:$0x1]  }
   0xc   :  { %v27_v4 = vld [vmem:[#allocation0] sm:$0x1]  }
   0xd   :  { %v6_v5 = vld [vmem:[#allocation0] sm:$0x1]  }
   0xe   :  { %8 = vst.msk [vmem:[%s118_s1] sm:$0x1] %vm7_vm0, %v6_v5   ;;  %16 = vrot.lane.b32.xlu0 %v15_v3, %s67_s11  ;;  %v33_v6 = vld [vmem:[#allocation0] sm:$0x1]  }
   0xf   :  { %28 = vrot.lane.b32.xlu1 %v27_v4, %s68_s12  ;;  %v39_v7 = vld [vmem:[#allocation0] sm:$0x1]  }
  0x10   :  { %v45_v8 = vld [vmem:[#allocation0] sm:$0x1]  }
  0x12   :  { %34 = vrot.lane.b32.xlu0 %v33_v6, %s69_s13 }
  0x13   :  { %40 = vrot.lane.b32.xlu1 %v39_v7, %s70_s14 }
  0x16   :  { %46 = vrot.lane.b32.xlu0 %v45_v8, %s71_s15 }
  0x7c   :  { %v11_v9 = vpop.permute.xlu0 %10  }
  0x7d   :  { %v23_v10 = vpop.permute.xlu1 %22   ;;  %51 = vst.msk [vmem:[%s118_s1 + $0x1] sm:$0x1] %vm7_vm0, %v11_v9  }
  0x7e   :  { %53 = vst.msk [vmem:[%s118_s1 + $0x3] sm:$0x1] %vm7_vm0, %v23_v10  }
  0x80   :  { %v17_v11 = vpop.permute.xlu0 %16  }
  0x81   :  { %v29_v12 = vpop.permute.xlu1 %28   ;;  %52 = vst.msk [vmem:[%s118_s1 + $0x2] sm:$0x1] %vm7_vm0, %v17_v11  }
  0x82   :  { %54 = vst.msk [vmem:[%s118_s1 + $0x4] sm:$0x1] %vm7_vm0, %v29_v12  }
  0x84   :  { %v35_v13 = vpop.permute.xlu0 %34  }
  0x85   :  { %v41_v14 = vpop.permute.xlu1 %40   ;;  %55 = vst.msk [vmem:[%s118_s1 + $0x5] sm:$0x1] %vm7_vm0, %v35_v13  }
  0x86   :  { %56 = vst.msk [vmem:[%s118_s1 + $0x6] sm:$0x1] %vm7_vm0, %v41_v14  }
  0x88   :  { %v47_v15 = vpop.permute.xlu0 %46  }
  0x89   :  { %57 = vst.msk [vmem:[%s118_s1 + $0x7] sm:$0x1] %vm7_vm0, %v47_v15  }

// kernel: _lstm2_forward_impl.1
= control target key start
LH: loop header
LB: loop body
LE: loop exit
PB: predicated region body
PF: predicated region fallthrough
CT: control target
= control target key end

     0   :  { %v40_v0 = vlaneseq  ;;  %vm83_vm0 = vcmask 1043456   ;;  %v1476_v1 = vmov 0.0   ;;  %v1477_v3 = vmov 1983009808   ;;  %s1479_s24 = smov 120   ;;  %s1480_s25 = smov 4   ;;  %s1872_s1 = inlined_call_operand.vmem [shape: f32[24,128], index: 1, kind: input, shape index: {}]   ;;  %s1873_s0 = inlined_call_operand.vmem [shape: f32[9,2,4], index: 0, kind: input, shape index: {}]   ;;  %s1874_s2 = inlined_call_operand.vmem [shape: f32[128,8], index: 2, kind: input, shape index: {}]   ;;  %s1875_s3 = inlined_call_operand.vmem [shape: f32[16,8], index: 3, kind: output, shape index: {}]  }
   0x1   :  { %1270 = vmatprep.subr.mxu1 %v1476_v1  ;;  %v1517_v2 = vld [vmem:[%s1872_s1] sm:$0xff]  ;;  %v38_v4 = vunpack.c.l.s4 %v1477_v3  ;;  %vm1478_vm1 = vmmov 0   ;;  %vm76_vm2 = vcmask 31744   ;;  %v1549_v18 = vld [vmem:[%s1872_s1 + $0x8] sm:$0xff]  ;;  %s1481_s26 = smov 8   ;;  %v1482_v46 = vmov 1  }
   0x2   :  { %v17_v5 = vld [vmem:[%s1873_s0] sm:$0x3]  ;;  %v1523_v6 = vshrl.u32 %v40_v0, 7  ;;  %1271 = vmatpush3.msk.msra.mxu1 %vm83_vm0, %v1517_v2  ;;  %1272 = vmatprep.mubr.msk.f32.mxu1 %vm1478_vm1, %v1476_v1  ;;  %v18_v7 = vld [vmem:[%s1873_s0 + $0x2] sm:$0x3]  ;;  %v249_v17 = vmul.f32 0.0, %v1517_v2  ;;  %v221_v26 = vcombine.high %v1549_v18, %v1549_v18 }
   0x3   :  { %v19_v8 = vld [vmem:[%s1873_s0 + $0x4] sm:$0x3]  ;;  %v39_v9 = vunpack.c.0.s8 %v38_v4  ;;  %v20_v10 = vld [vmem:[%s1873_s0 + $0x6] sm:$0x3]  ;;  %v35_v11 = vcombine.low %v17_v5, %v18_v7  ;;  %v254_v20 = vmul.f32 0.0, %v1549_v18  ;;  %1373 = vset.pattern.permute.xlu1 %v1482_v46  ;;  %v1483_v47 = vmov 0  }
   0x4   :  { %v36_v12 = vcombine.low %v19_v8, %v20_v10  ;;  %v251_v19 = vrot.slane %v249_v17, 2  ;;  %1372 = vset.pattern.permute.xlu0 %v1483_v47  ;;  %s1484_s27 = smov 116   ;;  %v247_v51 = vand.u32 127, %v40_v0  ;;  %v1485_v54 = vmov 2   ;;  %s1487_s28 = smov 124  }
   0x5   :  { %v1538_v13 = vsub.s32 %v39_v9, %v1523_v6  ;;  %v256_v22 = vrot.slane %v254_v20, 4  ;;  %v259_v24 = vrot.slane %v254_v20, 6  ;;  %v1486_v55 = vmov 3  }
   0x6   :  { %v253_v21 = vadd.f32 %v251_v19, %v249_v17  ;;  %vm248_vm3 = vcmp.ge.s32.totalorder %v247_v51, 2  ;;  %v333_v57 = vrot.slane %v1517_v2, 6  ;;  %v326_v58 = vrot.slane %v1517_v2, 4 }
   0x7   :  { %v43_v14 = vrot.slane %v35_v11, %v1538_v13  ;;  %v50_v15 = vrot.slane %v36_v12, %v1538_v13  ;;  %v1555_v28 = vrot.slane %v221_v26, %v1538_v13  ;;  %v347_v63 = vrot.slane %v1549_v18, 2 }
   0x8   :  { %v258_v23 = vadd.f32 %v256_v22, %v253_v21  ;;  %vm398_vm4 = vcmask 9216   ;;  %vm1045_vm5 = vcmask 1041408   ;;  %vm1038_vm6 = vcmask 15360  }
   0x9   :  { %v51_v16 = vcombine.low %v43_v14, %v50_v15  ;;  %vm1221_vm7 = vcmask 64512  }
   0xa   :  { %v261_v25 = vadd.f32 %v259_v24, %v258_v23 }
   0xb   :  { %1273 = vmatmul.mubr.msk.f32.vlgmr.msra.gmra.mrb[0].mxu1 %vm76_vm2, %v51_v16 }
   0xc   :  { %1275 = vmatprep.mubr.msk.f32.mxu1 %vm1478_vm1, %v1476_v1  ;;  %v263_v27 = vcombine.high %v261_v25, %v261_v25 }
   0xe   :  { %v270_v31 = vrot.slane %v263_v27, %v1538_v13 }
  0xde   :  { %v1557_v29 = vpop.f32.mrb[0].mxu1 }
  0xdf   :  { %v1561_v30 = vrot.slane %v1557_v29, %v1538_v13  ;;  %v1274_v32 = vpop.f32.mrb[1].mxu1  ;;  %v170_v51 = vcombine.high %v1557_v29, %v1557_v29 }
  0xe0   :  { %v1489_v32 = vmov 13  }
  0xe1   :  { %v237_v33 = vadd.f32 %v1555_v28, %v1561_v30  ;;  %v185_v4 = vcombine.high %v1561_v30, %v1561_v30 }
  0xe3   :  { %v272_v34 = vadd.f32 %v270_v31, %v237_v33  ;;  %v238_v11 = vadd.f32 %v1555_v28, %v185_v4  ;;  %v1488_v31 = vmov 12  }
  0xe5   :  { %1404 = vtanh.f32 %v272_v34  ;;  %v1233_v36 = vmul.f32 -1.442695, %v272_v34 }
  0xe7   :  { %1406 = vpow2.f32 %v1233_v36  ;;  %v1490_v36 = vmov 14  }
  0xef   :  { %v1405_v35 = vpop.eup %1404 }
  0xf0   :  { %282 = vrot.lane.b32.xlu0 %v1405_v35, %s1479_s24 }
  0xf1   :  { %v1407_v37 = vpop.eup %1406 }
  0xf2   :  { %v276_v38 = vadd.f32 1.0, %v1407_v37  ;;  %v1491_v37 = vmov 15  }
  0xf4   :  { %1408 = vrcp.f32 %v276_v38  ;;  %v1492_v38 = vmov 269488144  }
  0xfe   :  { %v1409_v39 = vpop.eup %1408 }
  0xff   :  { %v280_v42 = vmul.f32 0.0, %v1409_v39 }
 0x162   :  { %v283_v40 = vpop.permute.xlu0 %282 }
 0x163   :  { %v285_v41 = vmul.f32 %v1409_v39, %v283_v40  ;;  %v411_v40 = vcombine.high %v1517_v2, %v1517_v2  ;;  %v228_v2 = vrot.slane %v1549_v18, %v1538_v13 }
 0x165   :  { %287 = vrot.lane.b32.xlu0 %v285_v41, %s1480_s25 }
 0x1d7   :  { %v288_v43 = vpop.permute.xlu0 %287 }
 0x1d8   :  { %v290_v44 = vadd.f32 %v288_v43, %v280_v42  ;;  %v1601_v42 = vrot.slane %v411_v40, %v1538_v13 }
 0x1da   :  { %1410 = vtanh.f32 %v290_v44  ;;  %v316_v56 = vrot.slane %v290_v44, %v1538_v13  ;;  %v1608_v46 = vcombine.high %v1601_v42, %v1601_v42 }
 0x1e4   :  { %v1411_v45 = vpop.eup %1410 }
 0x1e5   :  { %293 = vrot.lane.b32.xlu1 %v1411_v45, %s1481_s26 }
 0x257   :  { %v294_v48 = vpop.permute.xlu1 %293 }
 0x258   :  { %v296_v49 = vmul.f32 %v1409_v39, %v294_v48  ;;  %v405_v39 = vunpack.c.l.s4 %v1492_v38 }
 0x25a   :  { %v304_v50 = vrot.slane %v296_v49, %v1538_v13  ;;  %v406_v41 = vunpack.c.0.s8 %v405_v39 }
 0x25c   :  { %305 = vrot.lane.b32.xlu1 %v304_v50, %s1484_s27  ;;  %v1604_v43 = vsub.s32 %v406_v41, %v1523_v6 }
 0x2ce   :  { %v306_v52 = vpop.permute.xlu1 %305 }
 0x2cf   :  { %v308_v53 = vsel %vm248_vm3, %v306_v52, 0.0 }
 0x2d0   :  { %330 = vperm.xlu1 %1373, %v308_v53   ;;  %323 = vperm.xlu0 %1372, %v308_v53  }
 0x2d4   :  { %1374 = vset.pattern.permute.xlu1 %v1485_v54  ;;  %1375 = vset.pattern.permute.xlu0 %v1486_v55  ;;  %v1620_v55 = vcombine.high %v228_v2, %v228_v2 }
 0x2d5   :  { %338 = vperm.xlu1 %1374, %v308_v53   ;;  %344 = vperm.xlu0 %1375, %v308_v53  }
 0x2d9   :  { %317 = vrot.lane.b32.xlu1 %v316_v56, %s1487_s28  ;;  %1377 = vset.pattern.permute.xlu0 %v1489_v32 }
 0x2da   :  { %1376 = vset.pattern.permute.xlu1 %v1488_v31 }
 0x34f   :  { %v331_v59 = vpop.permute.xlu1 %330  ;;  %v324_v60 = vpop.permute.xlu0 %323 }
 0x350   :  { %v335_v61 = vmul.f32 %v333_v57, %v331_v59  ;;  %v328_v62 = vmul.f32 %v326_v58, %v324_v60  ;;  %v184_v57 = vrot.slane %v170_v51, %v1538_v13 }
 0x352   :  { %v336_v5 = vadd.f32 %v335_v61, %v328_v62  ;;  %v239_v62 = vadd.f32 %v1555_v28, %v184_v57 }
 0x354   :  { %v339_v0 = vpop.permute.xlu1 %338  ;;  %v345_v3 = vpop.permute.xlu0 %344 }
 0x355   :  { %v341_v7 = vmul.f32 %v339_v0, %v1549_v18  ;;  %v349_v9 = vmul.f32 %v347_v63, %v345_v3 }
 0x357   :  { %v342_v8 = vadd.f32 %v341_v7, %v336_v5 }
 0x358   :  { %v318_v10 = vpop.permute.xlu1 %317 }
 0x359   :  { %v350_v12 = vadd.f32 %v349_v9, %v342_v8  ;;  %v320_v14 = vsel %vm248_vm3, %v318_v10, 0.0 }
 0x35a   :  { %v366_v15 = vrot.slane %v320_v14, %v1538_v13 }
 0x35b   :  { %v351_v16 = vadd.f32 %v350_v12, %v238_v11 }
 0x35c   :  { %367 = vrot.lane.b32.xlu0 %v366_v15, %s1480_s25 }
 0x35d   :  { %1412 = vtanh.f32 %v351_v16  ;;  %v1234_v19 = vmul.f32 -1.442695, %v351_v16 }
 0x35f   :  { %1414 = vpow2.f32 %v1234_v19 }
 0x367   :  { %v1413_v17 = vpop.eup %1412 }
 0x368   :  { %372 = vrot.lane.b32.xlu1 %v1413_v17, %s1479_s24 }
 0x369   :  { %v1415_v20 = vpop.eup %1414 }
 0x36a   :  { %v355_v21 = vadd.f32 1.0, %v1415_v20 }
 0x36c   :  { %1416 = vrcp.f32 %v355_v21 }
 0x376   :  { %v1417_v22 = vpop.eup %1416 }
 0x3ce   :  { %v368_v25 = vpop.permute.xlu0 %367 }
 0x3cf   :  { %v370_v26 = vmul.f32 %v1417_v22, %v368_v25 }
 0x3da   :  { %v373_v23 = vpop.permute.xlu1 %372 }
 0x3db   :  { %v375_v24 = vmul.f32 %v1417_v22, %v373_v23 }
 0x3dd   :  { %377 = vrot.lane.b32.xlu1 %v375_v24, %s1480_s25 }
 0x44f   :  { %v378_v27 = vpop.permute.xlu1 %377 }
 0x450   :  { %v380_v30 = vadd.f32 %v378_v27, %v370_v26 }
 0x452   :  { %1418 = vtanh.f32 %v380_v30 }
 0x45c   :  { %v1419_v33 = vpop.eup %1418 }
 0x45d   :  { %383 = vrot.lane.b32.xlu0 %v1419_v33, %s1481_s26 }
 0x4cf   :  { %v384_v34 = vpop.permute.xlu0 %383 }
 0x4d0   :  { %v1589_v35 = vmul.f32 %v1417_v22, %v384_v34 }
 0x4d2   :  { %422 = vperm.xlu0 %1377, %v1589_v35   ;;  %401 = vperm.xlu1 %1376, %v1589_v35  }
 0x4d6   :  { %1378 = vset.pattern.permute.xlu1 %v1490_v36 }
 0x4d7   :  { %437 = vperm.xlu1 %1378, %v1589_v35  }
 0x4db   :  { %1379 = vset.pattern.permute.xlu1 %v1491_v37 }
 0x4dc   :  { %450 = vperm.xlu1 %1379, %v1589_v35  }
 0x4e0   :  { %1380 = vset.pattern.permute.xlu1 %v1488_v31 }
 0x551   :  { %v423_v44 = vpop.permute.xlu0 %422  ;;  %v402_v45 = vpop.permute.xlu1 %401 }
 0x552   :  { %v431_v47 = vrot.slane %v423_v44, %v1604_v43  ;;  %v410_v48 = vrot.slane %v402_v45, %v1604_v43 }
 0x554   :  { %v434_v52 = vmul.f32 %v1608_v46, %v431_v47  ;;  %v420_v53 = vmul.f32 %v1601_v42, %v410_v48 }
 0x556   :  { %v438_v49 = vpop.permute.xlu1 %437  ;;  %v435_v58 = vadd.f32 %v434_v52, %v420_v53  ;;  %v21_v52 = vld [vmem:[%s1873_s0 + $0x8] sm:$0x3]  ;;  %v22_v53 = vld [vmem:[%s1873_s0 + $0xa] sm:$0x3] }
 0x557   :  { %v446_v50 = vrot.slane %v438_v49, %v1604_v43 }
 0x559   :  { %v447_v54 = vmul.f32 %v446_v50, %v1549_v18 }
 0x55b   :  { %v451_v56 = vpop.permute.xlu1 %450  ;;  %v448_v60 = vadd.f32 %v447_v54, %v435_v58  ;;  %v23_v54 = vld [vmem:[%s1873_s0 + $0xc] sm:$0x3] }
 0x55c   :  { %v459_v59 = vrot.slane %v451_v56, %v1604_v43  ;;  %v24_v56 = vld [vmem:[%s1873_s0 + $0xe] sm:$0x3] }
 0x55d   :  { %v53_v58 = vcombine.low %v23_v54, %v24_v56 }
 0x55e   :  { %v462_v61 = vmul.f32 %v1620_v55, %v459_v59 }
 0x560   :  { %v463_v29 = vadd.f32 %v462_v61, %v448_v60  ;;  %v67_v60 = vrot.slane %v53_v58, %v1538_v13 }
 0x562   :  { %v464_v63 = vadd.f32 %v463_v29, %v239_v62 }
 0x564   :  { %1420 = vtanh.f32 %v464_v63  ;;  %v1235_v3 = vmul.f32 -1.442695, %v464_v63 }
 0x566   :  { %1422 = vpow2.f32 %v1235_v3 }
 0x56e   :  { %v1421_v0 = vpop.eup %1420 }
 0x56f   :  { %474 = vrot.lane.b32.xlu0 %v1421_v0, %s1479_s24 }
 0x570   :  { %v1423_v4 = vpop.eup %1422 }
 0x571   :  { %v468_v5 = vadd.f32 1.0, %v1423_v4 }
 0x573   :  { %1424 = vrcp.f32 %v468_v5 }
 0x57d   :  { %v1425_v7 = vpop.eup %1424 }
 0x57e   :  { %v472_v10 = vmul.f32 %v1425_v7, %v380_v30  ;;  %v186_v30 = vcombine.high %v184_v57, %v184_v57  ;;  %v52_v57 = vcombine.low %v21_v52, %v22_v53 }
 0x580   :  { %v240_v40 = vadd.f32 %v1555_v28, %v186_v30  ;;  %v60_v59 = vrot.slane %v52_v57, %v1538_v13 }
 0x582   :  { %v68_v61 = vcombine.low %v60_v59, %v67_v60 }
 0x584   :  { %1276 = vmatmul.mubr.msk.f32.gmra.mrb[2].mxu1 %vm76_vm2, %v68_v61 }
 0x585   :  { %1278 = vmatprep.mubr.msk.f32.mxu1 %vm1478_vm1, %v1476_v1 }
 0x5e1   :  { %v475_v8 = vpop.permute.xlu0 %474 }
 0x5e2   :  { %v477_v9 = vmul.f32 %v1425_v7, %v475_v8 }
 0x5e4   :  { %479 = vrot.lane.b32.xlu1 %v477_v9, %s1480_s25 }
 0x656   :  { %v480_v11 = vpop.permute.xlu1 %479 }
 0x657   :  { %v482_v12 = vadd.f32 %v480_v11, %v472_v10  ;;  %v1676_v1 = vpop.f32.mrb[2].mxu1 }
 0x658   :  { %v1277_v5 = vpop.f32.mrb[3].mxu1 }
 0x659   :  { %1426 = vtanh.f32 %v482_v12 }
 0x663   :  { %v1427_v14 = vpop.eup %1426 }
 0x664   :  { %485 = vrot.lane.b32.xlu0 %v1427_v14, %s1481_s26 }
 0x6d6   :  { %v486_v15 = vpop.permute.xlu0 %485 }
 0x6d7   :  { %v1629_v16 = vmul.f32 %v1425_v7, %v486_v15 }
 0x6d9   :  { %514 = vperm.xlu0 %1377, %v1629_v16   ;;  %502 = vperm.xlu1 %1380, %v1629_v16  }
 0x6dd   :  { %1382 = vset.pattern.permute.xlu0 %v1491_v37  ;;  %1381 = vset.pattern.permute.xlu1 %v1490_v36 }
 0x6de   :  { %540 = vperm.xlu0 %1382, %v1629_v16   ;;  %527 = vperm.xlu1 %1381, %v1629_v16  }
 0x6e2   :  { %1384 = vset.pattern.permute.xlu0 %v1489_v32  ;;  %1383 = vset.pattern.permute.xlu1 %v1488_v31 }
 0x758   :  { %v515_v17 = vpop.permute.xlu0 %514  ;;  %v503_v19 = vpop.permute.xlu1 %502 }
 0x759   :  { %v523_v20 = vrot.slane %v515_v17, %v1604_v43  ;;  %v511_v21 = vrot.slane %v503_v19, %v1604_v43  ;;  %v194_v19 = vrot.slane %v1676_v1, %v1538_v13 }
 0x75b   :  { %v524_v22 = vmul.f32 %v523_v20, %v1608_v46  ;;  %v512_v23 = vmul.f32 %v511_v21, %v1601_v42  ;;  %v202_v61 = vcombine.high %v194_v19, %v194_v19 }
 0x75d   :  { %v541_v24 = vpop.permute.xlu0 %540  ;;  %v528_v25 = vpop.permute.xlu1 %527  ;;  %v525_v33 = vadd.f32 %v524_v22, %v512_v23 }
 0x75e   :  { %v549_v26 = vrot.slane %v541_v24, %v1604_v43  ;;  %v536_v27 = vrot.slane %v528_v25, %v1604_v43  ;;  %v241_v25 = vadd.f32 %v1555_v28, %v194_v19 }
 0x760   :  { %v537_v34 = vmul.f32 %v536_v27, %v1549_v18  ;;  %v550_v38 = vmul.f32 %v549_v26, %v1620_v55 }
 0x762   :  { %v538_v39 = vadd.f32 %v537_v34, %v525_v33 }
 0x764   :  { %v551_v41 = vadd.f32 %v550_v38, %v538_v39 }
 0x766   :  { %v552_v44 = vadd.f32 %v551_v41, %v240_v40 }
 0x768   :  { %1428 = vtanh.f32 %v552_v44  ;;  %v1236_v47 = vmul.f32 -1.442695, %v552_v44 }
 0x76a   :  { %1430 = vpow2.f32 %v1236_v47 }
 0x772   :  { %v1429_v45 = vpop.eup %1428 }
 0x773   :  { %562 = vrot.lane.b32.xlu1 %v1429_v45, %s1479_s24 }
 0x774   :  { %v1431_v48 = vpop.eup %1430 }
 0x775   :  { %v556_v49 = vadd.f32 1.0, %v1431_v48 }
 0x777   :  { %1432 = vrcp.f32 %v556_v49 }
 0x781   :  { %v1433_v2 = vpop.eup %1432 }
 0x782   :  { %v560_v62 = vmul.f32 %v1433_v2, %v482_v12 }
 0x7e5   :  { %v563_v50 = vpop.permute.xlu1 %562 }
 0x7e6   :  { %v565_v51 = vmul.f32 %v1433_v2, %v563_v50 }
 0x7e8   :  { %567 = vrot.lane.b32.xlu1 %v565_v51, %s1480_s25 }
 0x85a   :  { %v568_v29 = vpop.permute.xlu1 %567 }
 0x85b   :  { %v570_v63 = vadd.f32 %v568_v29, %v560_v62 }
 0x85d   :  { %1434 = vtanh.f32 %v570_v63 }
 0x867   :  { %v1435_v0 = vpop.eup %1434 }
 0x868   :  { %573 = vrot.lane.b32.xlu0 %v1435_v0, %s1481_s26 }
 0x8da   :  { %v574_v3 = vpop.permute.xlu0 %573 }
 0x8db   :  { %v1668_v4 = vmul.f32 %v1433_v2, %v574_v3  ;;  %v242_v3 = vadd.f32 %v1555_v28, %v202_v61 }
 0x8dd   :  { %602 = vperm.xlu0 %1384, %v1668_v4   ;;  %590 = vperm.xlu1 %1383, %v1668_v4  }
 0x8e1   :  { %1385 = vset.pattern.permute.xlu1 %v1490_v36 }
 0x8e2   :  { %615 = vperm.xlu1 %1385, %v1668_v4  }
 0x8e6   :  { %1386 = vset.pattern.permute.xlu1 %v1491_v37 }
 0x8e7   :  { %628 = vperm.xlu1 %1386, %v1668_v4  }
 0x8eb   :  { %1387 = vset.pattern.permute.xlu1 %v1488_v31 }
 0x95c   :  { %v603_v7 = vpop.permute.xlu0 %602  ;;  %v591_v8 = vpop.permute.xlu1 %590 }
 0x95d   :  { %v611_v9 = vrot.slane %v603_v7, %v1604_v43  ;;  %v599_v10 = vrot.slane %v591_v8, %v1604_v43 }
 0x95f   :  { %v612_v14 = vmul.f32 %v611_v9, %v1608_v46  ;;  %v600_v15 = vmul.f32 %v599_v10, %v1601_v42 }
 0x961   :  { %v616_v11 = vpop.permute.xlu1 %615  ;;  %v613_v21 = vadd.f32 %v612_v14, %v600_v15 }
 0x962   :  { %v624_v12 = vrot.slane %v616_v11, %v1604_v43 }
 0x964   :  { %v625_v17 = vmul.f32 %v624_v12, %v1549_v18 }
 0x966   :  { %v629_v20 = vpop.permute.xlu1 %628  ;;  %v626_v23 = vadd.f32 %v625_v17, %v613_v21 }
 0x967   :  { %v637_v22 = vrot.slane %v629_v20, %v1604_v43 }
 0x969   :  { %v638_v24 = vmul.f32 %v637_v22, %v1620_v55 }
 0x96b   :  { %v639_v26 = vadd.f32 %v638_v24, %v626_v23 }
 0x96d   :  { %v640_v27 = vadd.f32 %v639_v26, %v241_v25 }
 0x96f   :  { %1436 = vtanh.f32 %v640_v27  ;;  %v1237_v33 = vmul.f32 -1.442695, %v640_v27 }
 0x971   :  { %1438 = vpow2.f32 %v1237_v33 }
 0x979   :  { %v1437_v30 = vpop.eup %1436 }
 0x97a   :  { %650 = vrot.lane.b32.xlu0 %v1437_v30, %s1479_s24 }
 0x97b   :  { %v1439_v34 = vpop.eup %1438 }
 0x97c   :  { %v644_v38 = vadd.f32 1.0, %v1439_v34  ;;  %v187_v34 = vcombine.high %v1676_v1, %v1676_v1 }
 0x97e   :  { %1440 = vrcp.f32 %v644_v38 }
 0x988   :  { %v1441_v39 = vpop.eup %1440 }
 0x989   :  { %v648_v44 = vmul.f32 %v1441_v39, %v570_v63 }
 0x9ec   :  { %v651_v40 = vpop.permute.xlu0 %650 }
 0x9ed   :  { %v653_v41 = vmul.f32 %v1441_v39, %v651_v40 }
 0x9ef   :  { %655 = vrot.lane.b32.xlu1 %v653_v41, %s1480_s25 }
 0xa61   :  { %v656_v45 = vpop.permute.xlu1 %655 }
 0xa62   :  { %v658_v47 = vadd.f32 %v656_v45, %v648_v44  ;;  %v201_v44 = vrot.slane %v187_v34, %v1538_v13 }
 0xa64   :  { %1442 = vtanh.f32 %v658_v47 }
 0xa6e   :  { %v1443_v48 = vpop.eup %1442 }
 0xa6f   :  { %661 = vrot.lane.b32.xlu0 %v1443_v48, %s1481_s26 }
 0xae1   :  { %v662_v49 = vpop.permute.xlu0 %661 }
 0xae2   :  { %v1693_v2 = vmul.f32 %v1441_v39, %v662_v49 }
 0xae4   :  { %690 = vperm.xlu0 %1384, %v1693_v2   ;;  %678 = vperm.xlu1 %1387, %v1693_v2  }
 0xae8   :  { %1389 = vset.pattern.permute.xlu0 %v1491_v37  ;;  %1388 = vset.pattern.permute.xlu1 %v1490_v36 }
 0xae9   :  { %716 = vperm.xlu0 %1389, %v1693_v2   ;;  %703 = vperm.xlu1 %1388, %v1693_v2  }
 0xaed   :  { %1391 = vset.pattern.permute.xlu0 %v1489_v32  ;;  %1390 = vset.pattern.permute.xlu1 %v1488_v31 }
 0xb63   :  { %v691_v50 = vpop.permute.xlu0 %690  ;;  %v679_v51 = vpop.permute.xlu1 %678 }
 0xb64   :  { %v699_v52 = vrot.slane %v691_v50, %v1604_v43  ;;  %v687_v53 = vrot.slane %v679_v51, %v1604_v43  ;;  %v243_v50 = vadd.f32 %v1555_v28, %v201_v44 }
 0xb66   :  { %v700_v54 = vmul.f32 %v699_v52, %v1608_v46  ;;  %v688_v56 = vmul.f32 %v687_v53, %v1601_v42 }
 0xb68   :  { %v717_v57 = vpop.permute.xlu0 %716  ;;  %v704_v58 = vpop.permute.xlu1 %703  ;;  %v701_v62 = vadd.f32 %v700_v54, %v688_v56 }
 0xb69   :  { %v725_v59 = vrot.slane %v717_v57, %v1604_v43  ;;  %v712_v60 = vrot.slane %v704_v58, %v1604_v43 }
 0xb6b   :  { %v713_v29 = vmul.f32 %v712_v60, %v1549_v18  ;;  %v726_v63 = vmul.f32 %v725_v59, %v1620_v55 }
 0xb6d   :  { %v714_v0 = vadd.f32 %v713_v29, %v701_v62 }
 0xb6f   :  { %v727_v5 = vadd.f32 %v726_v63, %v714_v0 }
 0xb71   :  { %v728_v7 = vadd.f32 %v727_v5, %v242_v3 }
 0xb73   :  { %1444 = vtanh.f32 %v728_v7  ;;  %v1238_v9 = vmul.f32 -1.442695, %v728_v7 }
 0xb75   :  { %1446 = vpow2.f32 %v1238_v9 }
 0xb7d   :  { %v1445_v8 = vpop.eup %1444 }
 0xb7e   :  { %738 = vrot.lane.b32.xlu1 %v1445_v8, %s1479_s24 }
 0xb7f   :  { %v1447_v10 = vpop.eup %1446 }
 0xb80   :  { %v732_v11 = vadd.f32 1.0, %v1447_v10 }
 0xb82   :  { %1448 = vrcp.f32 %v732_v11 }
 0xb8c   :  { %v1449_v12 = vpop.eup %1448 }
 0xb8d   :  { %v736_v17 = vmul.f32 %v1449_v12, %v658_v47 }
 0xbf0   :  { %v739_v14 = vpop.permute.xlu1 %738 }
 0xbf1   :  { %v741_v15 = vmul.f32 %v1449_v12, %v739_v14 }
 0xbf3   :  { %743 = vrot.lane.b32.xlu1 %v741_v15, %s1480_s25 }
 0xc65   :  { %v744_v19 = vpop.permute.xlu1 %743 }
 0xc66   :  { %v746_v20 = vadd.f32 %v744_v19, %v736_v17  ;;  %v203_v17 = vcombine.high %v201_v44, %v201_v44 }
 0xc68   :  { %1450 = vtanh.f32 %v746_v20 }
 0xc72   :  { %v1451_v21 = vpop.eup %1450 }
 0xc73   :  { %749 = vrot.lane.b32.xlu0 %v1451_v21, %s1481_s26  ;;  %v244_v21 = vadd.f32 %v1555_v28, %v203_v17 }
 0xce5   :  { %v750_v22 = vpop.permute.xlu0 %749 }
 0xce6   :  { %v1715_v23 = vmul.f32 %v1449_v12, %v750_v22 }
 0xce8   :  { %778 = vperm.xlu0 %1391, %v1715_v23   ;;  %766 = vperm.xlu1 %1390, %v1715_v23  }
 0xcec   :  { %1392 = vset.pattern.permute.xlu1 %v1490_v36 }
 0xced   :  { %791 = vperm.xlu1 %1392, %v1715_v23  }
 0xcf1   :  { %1393 = vset.pattern.permute.xlu1 %v1491_v37 }
 0xcf2   :  { %804 = vperm.xlu1 %1393, %v1715_v23  }
 0xcf6   :  { %1394 = vset.pattern.permute.xlu1 %v1488_v31 }
 0xd67   :  { %v779_v24 = vpop.permute.xlu0 %778  ;;  %v767_v25 = vpop.permute.xlu1 %766 }
 0xd68   :  { %v787_v26 = vrot.slane %v779_v24, %v1604_v43  ;;  %v775_v27 = vrot.slane %v767_v25, %v1604_v43 }
 0xd6a   :  { %v788_v38 = vmul.f32 %v787_v26, %v1608_v46  ;;  %v776_v39 = vmul.f32 %v775_v27, %v1601_v42 }
 0xd6c   :  { %v792_v30 = vpop.permute.xlu1 %791  ;;  %v789_v45 = vadd.f32 %v788_v38, %v776_v39  ;;  %v1228_v39 = vld.sshfl [vmem:[%s1873_s0 + $0x10] sm:$0x3 pattern:$0x76325410] }
 0xd6d   :  { %v800_v33 = vrot.slane %v792_v30, %v1604_v43  ;;  %1279 = vmatmul.mubr.msk.f32.gmra.mrb[4].mxu1 %vm76_vm2, %v1228_v39 }
 0xd6f   :  { %v801_v40 = vmul.f32 %v800_v33, %v1549_v18 }
 0xd71   :  { %v805_v41 = vpop.permute.xlu1 %804  ;;  %v802_v48 = vadd.f32 %v801_v40, %v789_v45 }
 0xd72   :  { %v813_v47 = vrot.slane %v805_v41, %v1604_v43 }
 0xd74   :  { %v814_v49 = vmul.f32 %v813_v47, %v1620_v55 }
 0xd76   :  { %v815_v51 = vadd.f32 %v814_v49, %v802_v48 }
 0xd78   :  { %v816_v52 = vadd.f32 %v815_v51, %v243_v50 }
 0xd7a   :  { %1452 = vtanh.f32 %v816_v52  ;;  %v1239_v53 = vmul.f32 -1.442695, %v816_v52 }
 0xd7c   :  { %1454 = vpow2.f32 %v1239_v53 }
 0xd84   :  { %v1453_v1 = vpop.eup %1452 }
 0xd85   :  { %826 = vrot.lane.b32.xlu0 %v1453_v1, %s1479_s24 }
 0xd86   :  { %v1455_v54 = vpop.eup %1454 }
 0xd87   :  { %v820_v56 = vadd.f32 1.0, %v1455_v54 }
 0xd89   :  { %1456 = vrcp.f32 %v820_v56 }
 0xd93   :  { %v1457_v57 = vpop.eup %1456 }
 0xd94   :  { %v824_v60 = vmul.f32 %v1457_v57, %v746_v20 }
 0xdf7   :  { %v827_v58 = vpop.permute.xlu0 %826 }
 0xdf8   :  { %v829_v59 = vmul.f32 %v1457_v57, %v827_v58 }
 0xdfa   :  { %831 = vrot.lane.b32.xlu1 %v829_v59, %s1480_s25 }
 0xe40   :  { %v163_v49 = vpop.f32.mrb[4].mxu1 }
 0xe41   :  { %v1280_v50 = vpop.f32.mrb[5].mxu1 }
 0xe6c   :  { %v832_v61 = vpop.permute.xlu1 %831 }
 0xe6d   :  { %v834_v62 = vadd.f32 %v832_v61, %v824_v60 }
 0xe6f   :  { %1458 = vtanh.f32 %v834_v62 }
 0xe79   :  { %v1459_v29 = vpop.eup %1458 }
 0xe7a   :  { %837 = vrot.lane.b32.xlu0 %v1459_v29, %s1481_s26 }
 0xeec   :  { %v838_v63 = vpop.permute.xlu0 %837 }
 0xeed   :  { %v1739_v0 = vmul.f32 %v1457_v57, %v838_v63 }
 0xeef   :  { %866 = vperm.xlu0 %1391, %v1739_v0   ;;  %854 = vperm.xlu1 %1394, %v1739_v0  }
 0xef3   :  { %1396 = vset.pattern.permute.xlu0 %v1491_v37  ;;  %1395 = vset.pattern.permute.xlu1 %v1490_v36 }
 0xef4   :  { %892 = vperm.xlu0 %1396, %v1739_v0   ;;  %879 = vperm.xlu1 %1395, %v1739_v0  }
 0xef8   :  { %1398 = vset.pattern.permute.xlu0 %v1489_v32  ;;  %1397 = vset.pattern.permute.xlu1 %v1488_v31 }
 0xf6e   :  { %v867_v3 = vpop.permute.xlu0 %866  ;;  %v855_v5 = vpop.permute.xlu1 %854 }
 0xf6f   :  { %v875_v7 = vrot.slane %v867_v3, %v1604_v43  ;;  %v863_v8 = vrot.slane %v855_v5, %v1604_v43 }
 0xf71   :  { %v876_v9 = vmul.f32 %v875_v7, %v1608_v46  ;;  %v864_v10 = vmul.f32 %v863_v8, %v1601_v42 }
 0xf73   :  { %v893_v11 = vpop.permute.xlu0 %892  ;;  %v880_v12 = vpop.permute.xlu1 %879  ;;  %v877_v32 = vadd.f32 %v876_v9, %v864_v10 }
 0xf74   :  { %v901_v14 = vrot.slane %v893_v11, %v1604_v43  ;;  %v888_v15 = vrot.slane %v880_v12, %v1604_v43 }
 0xf76   :  { %v889_v31 = vmul.f32 %v888_v15, %v1549_v18  ;;  %v902_v19 = vmul.f32 %v901_v14, %v1620_v55 }
 0xf78   :  { %v890_v20 = vadd.f32 %v889_v31, %v877_v32 }
 0xf7a   :  { %v903_v22 = vadd.f32 %v902_v19, %v890_v20  ;;  %v496_v19 = vrot.slane %v1629_v16, %v1538_v13  ;;  %v1037_v20 = vrot.slane %v1549_v18, 6 }
 0xf7c   :  { %v904_v24 = vadd.f32 %v903_v22, %v244_v21  ;;  %v672_v21 = vrot.slane %v1693_v2, %v1538_v13  ;;  %1281 = vmatprep.subr.msk.mxu1 %vm1045_vm5, %v1037_v20  ;;  %v848_v22 = vrot.slane %v1739_v0, %v1538_v13  ;;  %v1126_v2 = vld [vmem:[%s1874_s2 + $0x8] sm:$0xff] }
 0xf7d   :  { %1282 = vmatpush3.msk.msra.mxu1 %vm1045_vm5, %v1037_v20 }
 0xf7e   :  { %1460 = vtanh.f32 %v904_v24  ;;  %v1240_v26 = vmul.f32 -1.442695, %v904_v24 }
 0xf80   :  { %1462 = vpow2.f32 %v1240_v26  ;;  %v1127_v26 = vld [vmem:[%s1874_s2 + $0x10] sm:$0xff] }
 0xf88   :  { %v1461_v25 = vpop.eup %1460 }
 0xf89   :  { %914 = vrot.lane.b32.xlu1 %v1461_v25, %s1479_s24 }
 0xf8a   :  { %v1463_v27 = vpop.eup %1462 }
 0xf8b   :  { %v908_v30 = vadd.f32 1.0, %v1463_v27 }
 0xf8d   :  { %1464 = vrcp.f32 %v908_v30  ;;  %v1128_v30 = vld [vmem:[%s1874_s2 + $0x18] sm:$0xff] }
 0xf97   :  { %v1465_v33 = vpop.eup %1464 }
 0xf98   :  { %v912_v40 = vmul.f32 %v1465_v33, %v834_v62 }
 0xffb   :  { %v915_v34 = vpop.permute.xlu1 %914 }
 0xffc   :  { %v917_v38 = vmul.f32 %v1465_v33, %v915_v34  ;;  %v1130_v34 = vld [vmem:[%s1874_s2 + $0x28] sm:$0xff] }
 0xffe   :  { %919 = vrot.lane.b32.xlu1 %v917_v38, %s1480_s25 }
0x1070   :  { %v920_v41 = vpop.permute.xlu1 %919 }
0x1071   :  { %v922_v44 = vadd.f32 %v920_v41, %v912_v40  ;;  %v1131_v40 = vld [vmem:[%s1874_s2 + $0x30] sm:$0xff]  ;;  %v1132_v41 = vld [vmem:[%s1874_s2 + $0x38] sm:$0xff] }
0x1073   :  { %1466 = vtanh.f32 %v922_v44 }
0x107d   :  { %v1467_v45 = vpop.eup %1466 }
0x107e   :  { %925 = vrot.lane.b32.xlu0 %v1467_v45, %s1481_s26  ;;  %v1333_v45 = vpack.c.bf16 %v1132_v41, %v1131_v40 }
0x10f0   :  { %v926_v47 = vpop.permute.xlu0 %925 }
0x10f1   :  { %v928_v48 = vmul.f32 %v1465_v33, %v926_v47  ;;  %v1129_v33 = vld [vmem:[%s1874_s2 + $0x20] sm:$0xff] }
0x10f2   :  { %v1329_v39 = vpack.c.bf16 %v1130_v34, %v1129_v33  ;;  %v1133_v47 = vld [vmem:[%s1874_s2 + $0x40] sm:$0xff] }
0x10f3   :  { %954 = vperm.xlu0 %1398, %v928_v48   ;;  %942 = vperm.xlu1 %1397, %v928_v48   ;;  %v936_v12 = vrot.slane %v928_v48, %v1538_v13 }
0x10f7   :  { %1399 = vset.pattern.permute.xlu1 %v1490_v36  ;;  %1401 = vset.pattern.permute.xlu0 %v1491_v37 }
0x10f8   :  { %967 = vperm.xlu1 %1399, %v928_v48  }
0x10fc   :  { %1400 = vset.pattern.permute.xlu1 %v1491_v37  ;;  %v210_v37 = vrot.slane %v163_v49, %v1538_v13 }
0x10fd   :  { %980 = vperm.xlu1 %1400, %v928_v48   ;;  %v1134_v48 = vld [vmem:[%s1874_s2 + $0x48] sm:$0xff] }
0x10fe   :  { %v245_v63 = vadd.f32 %v1555_v28, %v210_v37  ;;  %v584_v28 = vrot.slane %v1668_v4, %v1538_v13  ;;  %v1337_v50 = vpack.c.bf16 %v1134_v48, %v1133_v47 }
0x1172   :  { %v955_v51 = vpop.permute.xlu0 %954  ;;  %v943_v52 = vpop.permute.xlu1 %942 }
0x1173   :  { %v963_v1 = vrot.slane %v955_v51, %v1604_v43  ;;  %v951_v53 = vrot.slane %v943_v52, %v1604_v43  ;;  %v1135_v52 = vld [vmem:[%s1874_s2 + $0x50] sm:$0xff] }
0x1175   :  { %v964_v57 = vmul.f32 %v963_v1, %v1608_v46  ;;  %v952_v36 = vmul.f32 %v951_v53, %v1601_v42  ;;  %v1136_v1 = vld [vmem:[%s1874_s2 + $0x58] sm:$0xff] }
0x1176   :  { %v1341_v53 = vpack.c.bf16 %v1136_v1, %v1135_v52 }
0x1177   :  { %v968_v54 = vpop.permute.xlu1 %967  ;;  %v965_v60 = vadd.f32 %v964_v57, %v952_v36 }
0x1178   :  { %v976_v56 = vrot.slane %v968_v54, %v1604_v43  ;;  %v1137_v54 = vld [vmem:[%s1874_s2 + $0x60] sm:$0xff] }
0x117a   :  { %v977_v58 = vmul.f32 %v976_v56, %v1549_v18  ;;  %v1125_v18 = vld [vmem:[%s1874_s2] sm:$0xff]  ;;  %v1138_v56 = vld [vmem:[%s1874_s2 + $0x68] sm:$0xff] }
0x117b   :  { %v1321_v0 = vpack.c.bf16 %v1126_v2, %v1125_v18  ;;  %v1345_v57 = vpack.c.bf16 %v1138_v56, %v1137_v54 }
0x117c   :  { %v981_v59 = vpop.permute.xlu1 %980  ;;  %v978_v62 = vadd.f32 %v977_v58, %v965_v60  ;;  %v1140_v60 = vld [vmem:[%s1874_s2 + $0x78] sm:$0xff] }
0x117d   :  { %v989_v61 = vrot.slane %v981_v59, %v1604_v43  ;;  %v394_v43 = vrot.slane %v1589_v35, %v1538_v13  ;;  %1322 = vmatprep.subr.bf16.mxu0 %v1321_v0  ;;  %v1139_v59 = vld [vmem:[%s1874_s2 + $0x70] sm:$0xff] }
0x117e   :  { %1324 = vmatpush3.bf16.msra.mxu0 %v1321_v0 }
0x117f   :  { %v990_v29 = vmul.f32 %v989_v61, %v1620_v55  ;;  %v760_v55 = vrot.slane %v1715_v23, %v1538_v13  ;;  %v1349_v61 = vpack.c.bf16 %v1140_v60, %v1139_v59 }
0x1181   :  { %v991_v3 = vadd.f32 %v990_v29, %v978_v62  ;;  %v16_v62 = vld [vmem:[%s1872_s1 + $0x10] sm:$0xff] }
0x1182   :  { %v1142_v29 = vrot.slane %v16_v62, 1 }
0x1183   :  { %v992_v5 = vadd.f32 %v991_v3, %v245_v63  ;;  %v1035_v63 = vsub.s32 0, %v1523_v6 }
0x1184   :  { %1353 = vpush %v1142_v29 }
0x1185   :  { %1468 = vtanh.f32 %v992_v5  ;;  %v1241_v42 = vmul.f32 -1.442695, %v992_v5  ;;  %v1036_v3 = vrot.slane %v16_v62, %v1035_v63 }
0x1187   :  { %1470 = vpow2.f32 %v1241_v42 }
0x118f   :  { %v1469_v7 = vpop.eup %1468 }
0x1190   :  { %1002 = vrot.lane.b32.xlu0 %v1469_v7, %s1479_s24 }
0x1191   :  { %v1471_v46 = vpop.eup %1470 }
0x1192   :  { %v996_v8 = vadd.f32 1.0, %v1471_v46 }
0x1194   :  { %1472 = vrcp.f32 %v996_v8 }
0x119e   :  { %v1473_v9 = vpop.eup %1472 }
0x119f   :  { %v1000_v14 = vmul.f32 %v1473_v9, %v922_v44 }
0x11b5   :  { %s1354_s2 = spop %1353 }
0x1202   :  { %v1003_v10 = vpop.permute.xlu0 %1002 }
0x1203   :  { %v1005_v11 = vmul.f32 %v1473_v9, %v1003_v10  ;;  %v1144_v10 = vstv %s1354_s2 }
0x1205   :  { %1007 = vrot.lane.b32.xlu1 %v1005_v11, %s1480_s25 }
0x1209   :  { %395 = vrot.lane.b32.xlu1 %v394_v43, %s1484_s27 }
0x120d   :  { %585 = vrot.lane.b32.xlu1 %v584_v28, %s1484_s27 }
0x1211   :  { %761 = vrot.lane.b32.xlu1 %v760_v55, %s1484_s27 }
0x1215   :  { %937 = vrot.lane.b32.xlu1 %v936_v12, %s1484_s27 }
0x1277   :  { %v1008_v15 = vpop.permute.xlu1 %1007 }
0x1278   :  { %v1010_v17 = vadd.f32 %v1008_v15, %v1000_v14 }
0x127a   :  { %1474 = vtanh.f32 %v1010_v17 }
0x127b   :  { %v396_v35 = vpop.permute.xlu1 %395 }
0x127c   :  { %399 = vst.msk [vmem:[#allocation2] sm:$0x3] %vm398_vm4, %v396_v35 }
0x127f   :  { %v586_v4 = vpop.permute.xlu1 %585 }
0x1280   :  { %588 = vst.msk [vmem:[#allocation2 + $0x4] sm:$0x3] %vm398_vm4, %v586_v4 }
0x1283   :  { %v762_v32 = vpop.permute.xlu1 %761 }
0x1284   :  { %v1475_v31 = vpop.eup %1474  ;;  %764 = vst.msk [vmem:[#allocation2 + $0x8] sm:$0x3] %vm398_vm4, %v762_v32 }
0x1285   :  { %1013 = vrot.lane.b32.xlu0 %v1475_v31, %s1481_s26 }
0x1287   :  { %v938_v23 = vpop.permute.xlu1 %937 }
0x1288   :  { %940 = vst.msk [vmem:[#allocation2 + $0xc] sm:$0x3] %vm398_vm4, %v938_v23 }
0x1289   :  { %497 = vrot.lane.b32.xlu0 %v496_v19, %s1484_s27 }
0x128d   :  { %673 = vrot.lane.b32.xlu0 %v672_v21, %s1484_s27 }
0x1291   :  { %849 = vrot.lane.b32.xlu0 %v848_v22, %s1484_s27 }
0x12f7   :  { %v1014_v16 = vpop.permute.xlu0 %1013 }
0x12f8   :  { %v1016_v24 = vmul.f32 %v1473_v9, %v1014_v16 }
0x12fa   :  { %v1024_v25 = vrot.slane %v1016_v24, %v1538_v13  ;;  %v1325_v13 = vpack.c.bf16 %v1128_v30, %v1127_v26 }
0x12fb   :  { %v498_v27 = vpop.permute.xlu0 %497 }
0x12fc   :  { %500 = vst.msk [vmem:[#allocation2 + $0x2] sm:$0x3] %vm398_vm4, %v498_v27  ;;  %1025 = vrot.lane.b32.xlu0 %v1024_v25, %s1484_s27  ;;  %1326 = vmatprep.subr.bf16.mxu0 %v1325_v13 }
0x12fd   :  { %1328 = vmatpush3.bf16.msra.mxu0 %v1325_v13 }
0x12fe   :  { %1330 = vmatprep.subr.bf16.mxu0 %v1329_v39 }
0x12ff   :  { %v674_v38 = vpop.permute.xlu0 %673 }
0x1300   :  { %676 = vst.msk [vmem:[#allocation2 + $0x6] sm:$0x3] %vm398_vm4, %v674_v38 }
0x1301   :  { %1332 = vmatpush3.bf16.msra.mxu0 %v1329_v39 }
0x1302   :  { %1334 = vmatprep.subr.bf16.mxu0 %v1333_v45 }
0x1303   :  { %v850_v44 = vpop.permute.xlu0 %849 }
0x1304   :  { %852 = vst.msk [vmem:[#allocation2 + $0xa] sm:$0x3] %vm398_vm4, %v850_v44 }
0x1305   :  { %1336 = vmatpush3.bf16.msra.mxu0 %v1333_v45 }
0x1306   :  { %1338 = vmatprep.subr.bf16.mxu0 %v1337_v50 }
0x1307   :  { %v1029_v49 = vld [vmem:[#allocation2] sm:$0xff] }
0x1308   :  { %v1031_v51 = vmax.f32 %v1029_v49, 0.0 }
0x1309   :  { %1340 = vmatpush3.bf16.msra.mxu0 %v1337_v50 }
0x130a   :  { %1283 = vmatprep.mubr.msk.f32.mxu1 %vm1038_vm6, %v1031_v51  ;;  %1342 = vmatprep.subr.bf16.mxu0 %v1341_v53 }
0x130d   :  { %1344 = vmatpush3.bf16.msra.mxu0 %v1341_v53 }
0x130e   :  { %1346 = vmatprep.subr.bf16.mxu0 %v1345_v57 }
0x1311   :  { %1348 = vmatpush3.bf16.msra.mxu0 %v1345_v57 }
0x1312   :  { %1350 = vmatprep.subr.bf16.mxu0 %v1349_v61 }
0x1315   :  { %1352 = vmatpush3.bf16.msra.mxu0 %v1349_v61 }
0x136e   :  { %v1026_v36 = vpop.permute.xlu0 %1025 }
0x136f   :  { %1028 = vst.msk [vmem:[#allocation2 + $0xe] sm:$0x3] %vm398_vm4, %v1026_v36 }
0x1376   :  { %v1030_v58 = vld [vmem:[#allocation2 + $0x8] sm:$0xff] }
0x1377   :  { %v1032_v37 = vmax.f32 %v1030_v58, 0.0 }
0x1379   :  { %1284 = vmatmul.mubr.msk.f32.vlgmr.msra.gmra.mrb[6].mxu1 %vm1038_vm6, %v1032_v37 }
0x144c   :  { %v1285_v5 = vpop.f32.mrb[6].mxu1 }
0x144d   :  { %v1120_v7 = vadd.f32 %v1285_v5, %v1036_v3  ;;  %v1114_v42 = vpop.f32.mrb[7].mxu1 }
0x144e   :  { %v1115_v46 = vadd.f32 %v1114_v42, %v1036_v3 }
0x144f   :  { %v1124_v9 = vmax.f32 %v1120_v7, 0.0 }
0x1450   :  { %v1123_v8 = vmax.f32 %v1115_v46, 0.0 }
0x1452   :  { %1318 = vmatprep.mubr.f32.mxu0 %v1123_v8 }
0x1453   :  { %1319 = vmatmul.mubr.f32.vlgmr.msra.gmra.mrb[0].mxu0 %v1124_v9 }
0x1526   :  { %v1320_v11 = vpop.f32.mrb[0].mxu0 }
0x1527   :  { %v1218_v43 = vadd.f32 %v1320_v11, %v1144_v10  ;;  %v1212_v28 = vpop.f32.mrb[1].mxu0 }
0x1528   :  { %v1213_v55 = vadd.f32 %v1212_v28, %v1144_v10 }
0x1529   :  { %1223 = vst.msk [vmem:[%s1875_s3 + $0x8] sm:$0xff] %vm1221_vm7, %v1218_v43 }
0x152a   :  { %1222 = vst.msk [vmem:[%s1875_s3] sm:$0xff] %vm1221_vm7, %v1213_v55 }

</bundles_post_ra>
